<compile_context>
chip_gen: v5e
topology: v5e:2x2
jax: 0.10.0
libtpu: 0.0.40
codegen_flags: <defaults>
</compile_context>

<pallas_src>
import jax
import jax.numpy as jnp
from jax import lax
from jax.experimental import pallas as pl
from jax.experimental.pallas import tpu as pltpu

EPS = 1e-5
NC_PAD = 128   # lane-dense padded width of the classifier-head output
ND_PAD = 128   # lane-dense padded width of the domain-head output


def _bn_relu(h, gamma, beta):
    # BatchNorm1d (training mode): normalize over the batch axis, biased variance. f32 math.
    mean = jnp.mean(h, axis=0, keepdims=True)
    var = jnp.mean((h - mean) ** 2, axis=0, keepdims=True)
    return jnp.maximum((h - mean) * lax.rsqrt(var + EPS) * gamma + beta, 0.0)


def dann_kernel(x_ref, fw_ref, fb_ref,
                w1c_ref, cb_ref, b1_ref, g1_ref, be1_ref,
                w2_ref, b2_ref, g2_ref, be2_ref,
                w3_ref, b3_ref,
                y_ref, d_ref,
                h1_sc):
    k = pl.program_id(0)

    @pl.when(k == 0)
    def _():
        # featurizer: (flatten done in wrapper) + Linear(in_feature -> d_out), f32 accumulate
        feats = (jnp.dot(x_ref[...], fw_ref[...],
                         preferred_element_type=jnp.float32) + fb_ref[...])
        # fused [classifier | discriminator-layer-1] matmul; GradientReverseLayer fwd = identity
        fused = jnp.dot(feats.astype(jnp.bfloat16), w1c_ref[...],
                        preferred_element_type=jnp.float32)
        y_ref[...] = fused[:, :NC_PAD] + cb_ref[...]
        h1 = fused[:, NC_PAD:] + b1_ref[...]
        h1_sc[...] = _bn_relu(h1, g1_ref[...], be1_ref[...])
        d_ref[...] = jnp.zeros_like(d_ref)

    # discriminator layer 2, hidden-column tile k (BN stats are per-column -> tiling is exact)
    h2 = (jnp.dot(h1_sc[...].astype(jnp.bfloat16), w2_ref[...],
                  preferred_element_type=jnp.float32) + b2_ref[...])
    h2 = _bn_relu(h2, g2_ref[...], be2_ref[...])
    # domain head: accumulate over the hidden (K) axis into the resident output block
    d_ref[...] += jnp.dot(h2.astype(jnp.bfloat16), w3_ref[...],
                          preferred_element_type=jnp.float32)

    @pl.when(k == pl.num_programs(0) - 1)
    def _():
        d_ref[...] += b3_ref[...]


def dann_forward(x_nchw, p, n_classes, n_domains, tn=256):
    B = x_nchw.shape[0]
    x = x_nchw.reshape(B, -1).astype(jnp.bfloat16)  # row-major flatten == torch.flatten(x, 1)
    in_feature, d_out = p["fw"].shape
    hidden = p["w1"].shape[1]
    assert hidden % tn == 0
    nt = hidden // tn

    bf16 = jnp.bfloat16
    # bf16 MXU-operand weights; biases / BN affine params stay f32.
    fw = p["fw"].astype(bf16)
    cw_pad = jnp.zeros((d_out, NC_PAD), jnp.float32).at[:, :n_classes].set(p["cw"])
    w1c = jnp.concatenate([cw_pad, p["w1"]], axis=1).astype(bf16)   # [d_out, NC_PAD + hidden]
    cb_pad = jnp.zeros((1, NC_PAD), jnp.float32).at[:, :n_classes].set(p["cb"])
    w2 = p["w2"].astype(bf16)
    w3_pad = (jnp.zeros((hidden, ND_PAD), jnp.float32)
              .at[:, :n_domains].set(p["w3"]).astype(bf16))
    b3_pad = jnp.zeros((1, ND_PAD), jnp.float32).at[:, :n_domains].set(p["b3"])

    def full(shape):
        return pl.BlockSpec(shape, lambda k: (0, 0))

    in_specs = [
        full((B, in_feature)),            # x
        full((in_feature, d_out)),        # fw
        full((1, d_out)),                 # fb
        full((d_out, NC_PAD + hidden)),   # fused [cw_pad | w1]
        full((1, NC_PAD)),                # cb_pad
        full((1, hidden)),                # b1
        full((1, hidden)),                # g1
        full((1, hidden)),                # be1
        pl.BlockSpec((hidden, tn), lambda k: (0, k)),   # w2 column tile (pipelined)
        pl.BlockSpec((1, tn), lambda k: (0, k)),        # b2 tile
        pl.BlockSpec((1, tn), lambda k: (0, k)),        # g2 tile
        pl.BlockSpec((1, tn), lambda k: (0, k)),        # be2 tile
        pl.BlockSpec((tn, ND_PAD), lambda k: (k, 0)),   # w3 row tile (pipelined)
        full((1, ND_PAD)),                # b3_pad
    ]
    out_specs = (full((B, NC_PAD)), full((B, ND_PAD)))
    out_shape = (jax.ShapeDtypeStruct((B, NC_PAD), jnp.float32),
                 jax.ShapeDtypeStruct((B, ND_PAD), jnp.float32))

    y_pad, d_pad = pl.pallas_call(
        dann_kernel,
        out_shape=out_shape,
        grid_spec=pltpu.PrefetchScalarGridSpec(
            num_scalar_prefetch=0,
            grid=(nt,),
            in_specs=in_specs,
            out_specs=out_specs,
            scratch_shapes=[pltpu.VMEM((B, hidden), jnp.float32)],  # h1 (post BN+ReLU)
        ),
        compiler_params=pltpu.CompilerParams(
            # The single grid axis is a reduction for the domain head (and carries the
            # step-0 h1 dependence), so it must be "arbitrary".
            dimension_semantics=("arbitrary",),
            vmem_limit_bytes=32 * 1024 * 1024,
        ),
    )(x, fw, p["fb"], w1c, cb_pad, p["b1"], p["g1"], p["be1"],
      w2, p["b2"], p["g2"], p["be2"], w3_pad, b3_pad)

    # Lane-dense outputs -> slice to the logical widths in the wrapper.
    return y_pad[:, :n_classes], d_pad[:, :n_domains]


def dann_reference(x_nchw, p):
    # Pure-JAX f32 reference of the same forward pass.
    B = x_nchw.shape[0]
    x = x_nchw.reshape(B, -1)
    feats = x @ p["fw"] + p["fb"]
    y_pred = feats @ p["cw"] + p["cb"]
    f = feats * 1.0  # GradientReverseLayer forward (identity)

    def bn_relu(h, g, b):
        m = jnp.mean(h, axis=0, keepdims=True)
        v = jnp.mean((h - m) ** 2, axis=0, keepdims=True)
        return jnp.maximum((h - m) / jnp.sqrt(v + EPS) * g + b, 0.0)

    h = bn_relu(f @ p["w1"] + p["b1"], p["g1"], p["be1"])
    h = bn_relu(h @ p["w2"] + p["b2"], p["g2"], p["be2"])
    d_pred = h @ p["w3"] + p["b3"]
    return y_pred, d_pred


def init_params(key, in_feature, d_out, n_classes, hidden, n_domains):
    ks = jax.random.split(key, 6)
    s = 0.02
    f32 = jnp.float32
    return {
        "fw": jax.random.normal(ks[0], (in_feature, d_out), f32) * s,
        "fb": jnp.zeros((1, d_out), f32),
        "cw": jax.random.normal(ks[1], (d_out, n_classes), f32) * s,
        "cb": jnp.zeros((1, n_classes), f32),
        "w1": jax.random.normal(ks[2], (d_out, hidden), f32) * s,
        "b1": jnp.zeros((1, hidden), f32),
        "g1": jnp.ones((1, hidden), f32),
        "be1": jnp.zeros((1, hidden), f32),
        "w2": jax.random.normal(ks[3], (hidden, hidden), f32) * s,
        "b2": jnp.zeros((1, hidden), f32),
        "g2": jnp.ones((1, hidden), f32),
        "be2": jnp.zeros((1, hidden), f32),
        "w3": jax.random.normal(ks[4], (hidden, n_domains), f32) * s,
        "b3": jnp.zeros((1, n_domains), f32),
    }


if __name__ == "__main__":
    # Small deterministic example consistent with the module's forward.
    # TODO(synk): GradientReverseLayer's gradient negation is backward-only; not expressible
    # in a forward kernel (forward identity is implemented).
    B, C, H, W = 8, 4, 16, 16          # NCHW input; B=8 keeps f32 sublane alignment
    in_feature = C * H * W             # 1024
    d_out = 64                         # featurizer.d_out
    n_classes = 10
    hidden = 1024                      # DomainDiscriminator default hidden_size
    n_domains = 4

    key = jax.random.PRNGKey(0)
    kx, kp = jax.random.split(key)
    x = jax.random.normal(kx, (B, C, H, W), jnp.float32)
    params = init_params(kp, in_feature, d_out, n_classes, hidden, n_domains)

    y_pred, domains_pred = dann_forward(x, params, n_classes, n_domains)
    jax.block_until_ready((y_pred, domains_pred))

    y_ref, d_ref = dann_reference(x, params)
    assert y_pred.shape == (B, n_classes) and domains_pred.shape == (B, n_domains)
    # bf16 MXU operands vs f32 reference -> slightly looser tolerance.
    assert jnp.allclose(y_pred, y_ref, rtol=2e-2, atol=2e-2)
    assert jnp.allclose(domains_pred, d_ref, rtol=2e-2, atol=2e-2)

    print("KERNEL_OK")
</pallas_src>

<mosaic_0001>
module attributes {stable_mosaic.version = 11 : i64} {
  func.func @dann_kernel(%arg0: i32, %arg1: memref<8x1024xbf16, #tpu.memory_space<vmem>>, %arg2: memref<1024x64xbf16, #tpu.memory_space<vmem>>, %arg3: memref<1x64xf32, #tpu.memory_space<vmem>>, %arg4: memref<64x1152xbf16, #tpu.memory_space<vmem>>, %arg5: memref<1x128xf32, #tpu.memory_space<vmem>>, %arg6: memref<1x1024xf32, #tpu.memory_space<vmem>>, %arg7: memref<1x1024xf32, #tpu.memory_space<vmem>>, %arg8: memref<1x1024xf32, #tpu.memory_space<vmem>>, %arg9: memref<1024x256xbf16, #tpu.memory_space<vmem>>, %arg10: memref<1x256xf32, #tpu.memory_space<vmem>>, %arg11: memref<1x256xf32, #tpu.memory_space<vmem>>, %arg12: memref<1x256xf32, #tpu.memory_space<vmem>>, %arg13: memref<256x128xbf16, #tpu.memory_space<vmem>>, %arg14: memref<1x128xf32, #tpu.memory_space<vmem>>, %arg15: memref<8x128xf32, #tpu.memory_space<vmem>>, %arg16: memref<8x128xf32, #tpu.memory_space<vmem>>, %arg17: memref<8x1024xf32, #tpu.memory_space<vmem>>) attributes {dimension_semantics = [#tpu.dimension_semantics<arbitrary>], iteration_bounds = array<i64: 4>, scalar_prefetch = 0 : i64, scratch_operands = 1 : i64, tpu.core_type = #tpu.core_type<tc>, window_params = [{pipeline_mode = #tpu.pipeline_mode<synchronous>, transform_indices = @transform_0, window_bounds = array<i64: 8, 1024>}, {pipeline_mode = #tpu.pipeline_mode<synchronous>, transform_indices = @transform_1, window_bounds = array<i64: 1024, 64>}, {pipeline_mode = #tpu.pipeline_mode<synchronous>, transform_indices = @transform_2, window_bounds = array<i64: 1, 64>}, {pipeline_mode = #tpu.pipeline_mode<synchronous>, transform_indices = @transform_3, window_bounds = array<i64: 64, 1152>}, {pipeline_mode = #tpu.pipeline_mode<synchronous>, transform_indices = @transform_4, window_bounds = array<i64: 1, 128>}, {pipeline_mode = #tpu.pipeline_mode<synchronous>, transform_indices = @transform_5, window_bounds = array<i64: 1, 1024>}, {pipeline_mode = #tpu.pipeline_mode<synchronous>, transform_indices = @transform_6, window_bounds = array<i64: 1, 1024>}, {pipeline_mode = #tpu.pipeline_mode<synchronous>, transform_indices = @transform_7, window_bounds = array<i64: 1, 1024>}, {transform_indices = @transform_8, window_bounds = array<i64: 1024, 256>}, {transform_indices = @transform_9, window_bounds = array<i64: 1, 256>}, {transform_indices = @transform_10, window_bounds = array<i64: 1, 256>}, {transform_indices = @transform_11, window_bounds = array<i64: 1, 256>}, {transform_indices = @transform_12, window_bounds = array<i64: 256, 128>}, {pipeline_mode = #tpu.pipeline_mode<synchronous>, transform_indices = @transform_13, window_bounds = array<i64: 1, 128>}, {pipeline_mode = #tpu.pipeline_mode<synchronous>, transform_indices = @transform_14, window_bounds = array<i64: 8, 128>}, {pipeline_mode = #tpu.pipeline_mode<synchronous>, transform_indices = @transform_15, window_bounds = array<i64: 8, 128>}]} {
    %c0_i32 = arith.constant 0 : i32
    %0 = arith.cmpi eq, %arg0, %c0_i32 : i32
    %1 = arith.extui %0 : i1 to i32
    %c0_i32_0 = arith.constant 0 : i32
    %2 = arith.cmpi ne, %1, %c0_i32_0 : i32
    scf.if %2 {
      %c0_24 = arith.constant 0 : index
      %c0_25 = arith.constant 0 : index
      %45 = vector.load %arg1[%c0_24, %c0_25] : memref<8x1024xbf16, #tpu.memory_space<vmem>>, vector<8x1024xbf16>
      %c0_26 = arith.constant 0 : index
      %c0_27 = arith.constant 0 : index
      %46 = vector.load %arg2[%c0_26, %c0_27] : memref<1024x64xbf16, #tpu.memory_space<vmem>>, vector<1024x64xbf16>
      %cst_28 = arith.constant dense<0.000000e+00> : vector<8x64xf32>
      %47 = tpu.matmul %45, %46, %cst_28 {dimension_numbers = #tpu.dot_dimension_numbers<[1], [0], [0], [1], [0, 0, 1, 1], [], []>} : vector<8x1024xbf16>, vector<1024x64xbf16>, vector<8x64xf32> -> vector<8x64xf32>
      %c0_29 = arith.constant 0 : index
      %c0_30 = arith.constant 0 : index
      %48 = vector.load %arg3[%c0_29, %c0_30] : memref<1x64xf32, #tpu.memory_space<vmem>>, vector<1x64xf32>
      %49 = vector.broadcast %48 : vector<1x64xf32> to vector<8x64xf32>
      %50 = arith.addf %47, %49 : vector<8x64xf32>
      %51 = arith.truncf %50 : vector<8x64xf32> to vector<8x64xbf16>
      %c0_31 = arith.constant 0 : index
      %c0_32 = arith.constant 0 : index
      %52 = vector.load %arg4[%c0_31, %c0_32] : memref<64x1152xbf16, #tpu.memory_space<vmem>>, vector<64x1152xbf16>
      %cst_33 = arith.constant dense<0.000000e+00> : vector<8x1152xf32>
      %53 = tpu.matmul %51, %52, %cst_33 {dimension_numbers = #tpu.dot_dimension_numbers<[1], [0], [0], [1], [0, 0, 1, 1], [], []>} : vector<8x64xbf16>, vector<64x1152xbf16>, vector<8x1152xf32> -> vector<8x1152xf32>
      %54 = vector.extract_strided_slice %53 {offsets = [0, 0], sizes = [8, 128], strides = [1, 1]} : vector<8x1152xf32> to vector<8x128xf32>
      %c0_34 = arith.constant 0 : index
      %c0_35 = arith.constant 0 : index
      %55 = vector.load %arg5[%c0_34, %c0_35] : memref<1x128xf32, #tpu.memory_space<vmem>>, vector<1x128xf32>
      %56 = vector.broadcast %55 : vector<1x128xf32> to vector<8x128xf32>
      %57 = arith.addf %54, %56 : vector<8x128xf32>
      %c0_36 = arith.constant 0 : index
      %c0_37 = arith.constant 0 : index
      %58 = vector.load %arg15[%c0_36, %c0_37] : memref<8x128xf32, #tpu.memory_space<vmem>>, vector<8x128xf32>
      tpu.vector_store %arg15[%c0_36, %c0_37], %57 {strides = array<i32>} : memref<8x128xf32, #tpu.memory_space<vmem>>, vector<8x128xf32>,
      %59 = vector.extract_strided_slice %53 {offsets = [0, 128], sizes = [8, 1024], strides = [1, 1]} : vector<8x1152xf32> to vector<8x1024xf32>
      %c0_38 = arith.constant 0 : index
      %c0_39 = arith.constant 0 : index
      %60 = vector.load %arg6[%c0_38, %c0_39] : memref<1x1024xf32, #tpu.memory_space<vmem>>, vector<1x1024xf32>
      %61 = vector.broadcast %60 : vector<1x1024xf32> to vector<8x1024xf32>
      %62 = arith.addf %59, %61 : vector<8x1024xf32>
      %c0_40 = arith.constant 0 : index
      %c0_41 = arith.constant 0 : index
      %63 = vector.load %arg7[%c0_40, %c0_41] : memref<1x1024xf32, #tpu.memory_space<vmem>>, vector<1x1024xf32>
      %c0_42 = arith.constant 0 : index
      %c0_43 = arith.constant 0 : index
      %64 = vector.load %arg8[%c0_42, %c0_43] : memref<1x1024xf32, #tpu.memory_space<vmem>>, vector<1x1024xf32>
      %cst_44 = arith.constant dense<0.000000e+00> : vector<1024xf32>
      %65 = vector.multi_reduction <add>, %62, %cst_44 [0] : vector<8x1024xf32> to vector<1024xf32>
      %66 = vector.shape_cast %65 : vector<1024xf32> to vector<1x1024xf32>
      %cst_45 = arith.constant 8.000000e+00 : f32
      %67 = vector.broadcast %cst_45 : f32 to vector<1x1024xf32>
      %68 = arith.divf %66, %67 : vector<1x1024xf32>
      %69 = vector.broadcast %68 : vector<1x1024xf32> to vector<8x1024xf32>
      %70 = arith.subf %62, %69 : vector<8x1024xf32>
      %71 = arith.mulf %70, %70 : vector<8x1024xf32>
      %cst_46 = arith.constant dense<0.000000e+00> : vector<1024xf32>
      %72 = vector.multi_reduction <add>, %71, %cst_46 [0] : vector<8x1024xf32> to vector<1024xf32>
      %73 = vector.shape_cast %72 : vector<1024xf32> to vector<1x1024xf32>
      %cst_47 = arith.constant 8.000000e+00 : f32
      %74 = vector.broadcast %cst_47 : f32 to vector<1x1024xf32>
      %75 = arith.divf %73, %74 : vector<1x1024xf32>
      %76 = vector.broadcast %68 : vector<1x1024xf32> to vector<8x1024xf32>
      %77 = arith.subf %62, %76 : vector<8x1024xf32>
      %cst_48 = arith.constant 9.99999974E-6 : f32
      %78 = vector.broadcast %cst_48 : f32 to vector<1x1024xf32>
      %79 = arith.addf %75, %78 : vector<1x1024xf32>
      %80 = math.rsqrt %79 : vector<1x1024xf32>
      %81 = vector.broadcast %80 : vector<1x1024xf32> to vector<8x1024xf32>
      %82 = arith.mulf %77, %81 : vector<8x1024xf32>
      %83 = vector.broadcast %63 : vector<1x1024xf32> to vector<8x1024xf32>
      %84 = arith.mulf %82, %83 : vector<8x1024xf32>
      %85 = vector.broadcast %64 : vector<1x1024xf32> to vector<8x1024xf32>
      %86 = arith.addf %84, %85 : vector<8x1024xf32>
      %cst_49 = arith.constant 0.000000e+00 : f32
      %87 = vector.broadcast %cst_49 : f32 to vector<8x1024xf32>
      %88 = arith.maximumf %86, %87 : vector<8x1024xf32>
      %c0_50 = arith.constant 0 : index
      %c0_51 = arith.constant 0 : index
      %89 = vector.load %arg17[%c0_50, %c0_51] : memref<8x1024xf32, #tpu.memory_space<vmem>>, vector<8x1024xf32>
      tpu.vector_store %arg17[%c0_50, %c0_51], %88 {strides = array<i32>} : memref<8x1024xf32, #tpu.memory_space<vmem>>, vector<8x1024xf32>,
      %cst_52 = arith.constant 0.000000e+00 : f32
      %90 = vector.broadcast %cst_52 : f32 to vector<8x128xf32>
      %c0_53 = arith.constant 0 : index
      %c0_54 = arith.constant 0 : index
      %91 = vector.load %arg16[%c0_53, %c0_54] : memref<8x128xf32, #tpu.memory_space<vmem>>, vector<8x128xf32>
      tpu.vector_store %arg16[%c0_53, %c0_54], %90 {strides = array<i32>} : memref<8x128xf32, #tpu.memory_space<vmem>>, vector<8x128xf32>,
    } else {
    }
    %c0 = arith.constant 0 : index
    %c0_1 = arith.constant 0 : index
    %3 = vector.load %arg17[%c0, %c0_1] : memref<8x1024xf32, #tpu.memory_space<vmem>>, vector<8x1024xf32>
    %4 = arith.truncf %3 : vector<8x1024xf32> to vector<8x1024xbf16>
    %c0_2 = arith.constant 0 : index
    %c0_3 = arith.constant 0 : index
    %5 = vector.load %arg9[%c0_2, %c0_3] : memref<1024x256xbf16, #tpu.memory_space<vmem>>, vector<1024x256xbf16>
    %cst = arith.constant dense<0.000000e+00> : vector<8x256xf32>
    %6 = tpu.matmul %4, %5, %cst {dimension_numbers = #tpu.dot_dimension_numbers<[1], [0], [0], [1], [0, 0, 1, 1], [], []>} : vector<8x1024xbf16>, vector<1024x256xbf16>, vector<8x256xf32> -> vector<8x256xf32>
    %c0_4 = arith.constant 0 : index
    %c0_5 = arith.constant 0 : index
    %7 = vector.load %arg10[%c0_4, %c0_5] : memref<1x256xf32, #tpu.memory_space<vmem>>, vector<1x256xf32>
    %8 = vector.broadcast %7 : vector<1x256xf32> to vector<8x256xf32>
    %9 = arith.addf %6, %8 : vector<8x256xf32>
    %c0_6 = arith.constant 0 : index
    %c0_7 = arith.constant 0 : index
    %10 = vector.load %arg11[%c0_6, %c0_7] : memref<1x256xf32, #tpu.memory_space<vmem>>, vector<1x256xf32>
    %c0_8 = arith.constant 0 : index
    %c0_9 = arith.constant 0 : index
    %11 = vector.load %arg12[%c0_8, %c0_9] : memref<1x256xf32, #tpu.memory_space<vmem>>, vector<1x256xf32>
    %cst_10 = arith.constant dense<0.000000e+00> : vector<256xf32>
    %12 = vector.multi_reduction <add>, %9, %cst_10 [0] : vector<8x256xf32> to vector<256xf32>
    %13 = vector.shape_cast %12 : vector<256xf32> to vector<1x256xf32>
    %cst_11 = arith.constant 8.000000e+00 : f32
    %14 = vector.broadcast %cst_11 : f32 to vector<1x256xf32>
    %15 = arith.divf %13, %14 : vector<1x256xf32>
    %16 = vector.broadcast %15 : vector<1x256xf32> to vector<8x256xf32>
    %17 = arith.subf %9, %16 : vector<8x256xf32>
    %18 = arith.mulf %17, %17 : vector<8x256xf32>
    %cst_12 = arith.constant dense<0.000000e+00> : vector<256xf32>
    %19 = vector.multi_reduction <add>, %18, %cst_12 [0] : vector<8x256xf32> to vector<256xf32>
    %20 = vector.shape_cast %19 : vector<256xf32> to vector<1x256xf32>
    %cst_13 = arith.constant 8.000000e+00 : f32
    %21 = vector.broadcast %cst_13 : f32 to vector<1x256xf32>
    %22 = arith.divf %20, %21 : vector<1x256xf32>
    %23 = vector.broadcast %15 : vector<1x256xf32> to vector<8x256xf32>
    %24 = arith.subf %9, %23 : vector<8x256xf32>
    %cst_14 = arith.constant 9.99999974E-6 : f32
    %25 = vector.broadcast %cst_14 : f32 to vector<1x256xf32>
    %26 = arith.addf %22, %25 : vector<1x256xf32>
    %27 = math.rsqrt %26 : vector<1x256xf32>
    %28 = vector.broadcast %27 : vector<1x256xf32> to vector<8x256xf32>
    %29 = arith.mulf %24, %28 : vector<8x256xf32>
    %30 = vector.broadcast %10 : vector<1x256xf32> to vector<8x256xf32>
    %31 = arith.mulf %29, %30 : vector<8x256xf32>
    %32 = vector.broadcast %11 : vector<1x256xf32> to vector<8x256xf32>
    %33 = arith.addf %31, %32 : vector<8x256xf32>
    %cst_15 = arith.constant 0.000000e+00 : f32
    %34 = vector.broadcast %cst_15 : f32 to vector<8x256xf32>
    %35 = arith.maximumf %33, %34 : vector<8x256xf32>
    %c0_16 = arith.constant 0 : index
    %c0_17 = arith.constant 0 : index
    %36 = vector.load %arg16[%c0_16, %c0_17] : memref<8x128xf32, #tpu.memory_space<vmem>>, vector<8x128xf32>
    %37 = arith.truncf %35 : vector<8x256xf32> to vector<8x256xbf16>
    %c0_18 = arith.constant 0 : index
    %c0_19 = arith.constant 0 : index
    %38 = vector.load %arg13[%c0_18, %c0_19] : memref<256x128xbf16, #tpu.memory_space<vmem>>, vector<256x128xbf16>
    %cst_20 = arith.constant dense<0.000000e+00> : vector<8x128xf32>
    %39 = tpu.matmul %37, %38, %cst_20 {dimension_numbers = #tpu.dot_dimension_numbers<[1], [0], [0], [1], [0, 0, 1, 1], [], []>} : vector<8x256xbf16>, vector<256x128xbf16>, vector<8x128xf32> -> vector<8x128xf32>
    %40 = arith.addf %36, %39 : vector<8x128xf32>
    %c0_21 = arith.constant 0 : index
    %c0_22 = arith.constant 0 : index
    %41 = vector.load %arg16[%c0_21, %c0_22] : memref<8x128xf32, #tpu.memory_space<vmem>>, vector<8x128xf32>
    tpu.vector_store %arg16[%c0_21, %c0_22], %40 {strides = array<i32>} : memref<8x128xf32, #tpu.memory_space<vmem>>, vector<8x128xf32>,
    %c3_i32 = arith.constant 3 : i32
    %42 = arith.cmpi eq, %arg0, %c3_i32 : i32
    %43 = arith.extui %42 : i1 to i32
    %c0_i32_23 = arith.constant 0 : i32
    %44 = arith.cmpi ne, %43, %c0_i32_23 : i32
    scf.if %44 {
      %c0_24 = arith.constant 0 : index
      %c0_25 = arith.constant 0 : index
      %45 = vector.load %arg16[%c0_24, %c0_25] : memref<8x128xf32, #tpu.memory_space<vmem>>, vector<8x128xf32>
      %c0_26 = arith.constant 0 : index
      %c0_27 = arith.constant 0 : index
      %46 = vector.load %arg14[%c0_26, %c0_27] : memref<1x128xf32, #tpu.memory_space<vmem>>, vector<1x128xf32>
      %47 = vector.broadcast %46 : vector<1x128xf32> to vector<8x128xf32>
      %48 = arith.addf %45, %47 : vector<8x128xf32>
      %c0_28 = arith.constant 0 : index
      %c0_29 = arith.constant 0 : index
      %49 = vector.load %arg16[%c0_28, %c0_29] : memref<8x128xf32, #tpu.memory_space<vmem>>, vector<8x128xf32>
      tpu.vector_store %arg16[%c0_28, %c0_29], %48 {strides = array<i32>} : memref<8x128xf32, #tpu.memory_space<vmem>>, vector<8x128xf32>,
    } else {
    }
    return
  }
  func.func @transform_0(%arg0: i32) -> (i32, i32) {
    %c0_i32 = arith.constant 0 : i32
    %c0_i32_0 = arith.constant 0 : i32
    %c0_i32_1 = arith.constant 0 : i32
    return %c0_i32, %c0_i32_0 : i32, i32
  }
  func.func @transform_1(%arg0: i32) -> (i32, i32) {
    %c0_i32 = arith.constant 0 : i32
    %c0_i32_0 = arith.constant 0 : i32
    %c0_i32_1 = arith.constant 0 : i32
    return %c0_i32, %c0_i32_0 : i32, i32
  }
  func.func @transform_2(%arg0: i32) -> (i32, i32) {
    %c0_i32 = arith.constant 0 : i32
    %c0_i32_0 = arith.constant 0 : i32
    %c0_i32_1 = arith.constant 0 : i32
    return %c0_i32, %c0_i32_0 : i32, i32
  }
  func.func @transform_3(%arg0: i32) -> (i32, i32) {
    %c0_i32 = arith.constant 0 : i32
    %c0_i32_0 = arith.constant 0 : i32
    %c0_i32_1 = arith.constant 0 : i32
    return %c0_i32, %c0_i32_0 : i32, i32
  }
  func.func @transform_4(%arg0: i32) -> (i32, i32) {
    %c0_i32 = arith.constant 0 : i32
    %c0_i32_0 = arith.constant 0 : i32
    %c0_i32_1 = arith.constant 0 : i32
    return %c0_i32, %c0_i32_0 : i32, i32
  }
  func.func @transform_5(%arg0: i32) -> (i32, i32) {
    %c0_i32 = arith.constant 0 : i32
    %c0_i32_0 = arith.constant 0 : i32
    %c0_i32_1 = arith.constant 0 : i32
    return %c0_i32, %c0_i32_0 : i32, i32
  }
  func.func @transform_6(%arg0: i32) -> (i32, i32) {
    %c0_i32 = arith.constant 0 : i32
    %c0_i32_0 = arith.constant 0 : i32
    %c0_i32_1 = arith.constant 0 : i32
    return %c0_i32, %c0_i32_0 : i32, i32
  }
  func.func @transform_7(%arg0: i32) -> (i32, i32) {
    %c0_i32 = arith.constant 0 : i32
    %c0_i32_0 = arith.constant 0 : i32
    %c0_i32_1 = arith.constant 0 : i32
    return %c0_i32, %c0_i32_0 : i32, i32
  }
  func.func @transform_8(%arg0: i32) -> (i32, i32) {
    %c0_i32 = arith.constant 0 : i32
    %c0_i32_0 = arith.constant 0 : i32
    return %c0_i32, %arg0 : i32, i32
  }
  func.func @transform_9(%arg0: i32) -> (i32, i32) {
    %c0_i32 = arith.constant 0 : i32
    %c0_i32_0 = arith.constant 0 : i32
    return %c0_i32, %arg0 : i32, i32
  }
  func.func @transform_10(%arg0: i32) -> (i32, i32) {
    %c0_i32 = arith.constant 0 : i32
    %c0_i32_0 = arith.constant 0 : i32
    return %c0_i32, %arg0 : i32, i32
  }
  func.func @transform_11(%arg0: i32) -> (i32, i32) {
    %c0_i32 = arith.constant 0 : i32
    %c0_i32_0 = arith.constant 0 : i32
    return %c0_i32, %arg0 : i32, i32
  }
  func.func @transform_12(%arg0: i32) -> (i32, i32) {
    %c0_i32 = arith.constant 0 : i32
    %c0_i32_0 = arith.constant 0 : i32
    return %arg0, %c0_i32 : i32, i32
  }
  func.func @transform_13(%arg0: i32) -> (i32, i32) {
    %c0_i32 = arith.constant 0 : i32
    %c0_i32_0 = arith.constant 0 : i32
    %c0_i32_1 = arith.constant 0 : i32
    return %c0_i32, %c0_i32_0 : i32, i32
  }
  func.func @transform_14(%arg0: i32) -> (i32, i32) {
    %c0_i32 = arith.constant 0 : i32
    %c0_i32_0 = arith.constant 0 : i32
    %c0_i32_1 = arith.constant 0 : i32
    return %c0_i32, %c0_i32_0 : i32, i32
  }
  func.func @transform_15(%arg0: i32) -> (i32, i32) {
    %c0_i32 = arith.constant 0 : i32
    %c0_i32_0 = arith.constant 0 : i32
    %c0_i32_1 = arith.constant 0 : i32
    return %c0_i32, %c0_i32_0 : i32, i32
  }
}

</mosaic_0001>

<bundles_post_ra>
// kernel: tpu_custom_call.1
= control target key start
LH: loop header
LB: loop body
LE: loop exit
PB: predicated region body
PF: predicated region fallthrough
CT: control target
= control target key end

     0   :  { %s6655_s0 = inlined_call_operand.hbm [shape: bf16[8,1024], index: 0, kind: input, shape index: {}]   ;;  %s6656_s1 = inlined_call_operand.vmem [shape: bf16[1024,64], index: 1, kind: input, shape index: {}]   ;;  %s6657_s2 = inlined_call_operand.hbm [shape: f32[1,64], index: 2, kind: input, shape index: {}]   ;;  %s6658_s3 = inlined_call_operand.hbm [shape: bf16[64,1152], index: 3, kind: input, shape index: {}]   ;;  %s6659_s4 = inlined_call_operand.hbm [shape: f32[1,128], index: 4, kind: input, shape index: {}]   ;;  %s6660_s5 = inlined_call_operand.hbm [shape: f32[1,1024], index: 5, kind: input, shape index: {}]   ;;  %s6661_s6 = inlined_call_operand.hbm [shape: f32[1,1024], index: 6, kind: input, shape index: {}]   ;;  %s6662_s7 = inlined_call_operand.hbm [shape: f32[1,1024], index: 7, kind: input, shape index: {}]   ;;  %s6663_s8 = inlined_call_operand.hbm [shape: bf16[1024,1024], index: 8, kind: input, shape index: {}]   ;;  %s6664_s9 = inlined_call_operand.hbm [shape: f32[1,1024], index: 9, kind: input, shape index: {}]   ;;  %s6665_s10 = inlined_call_operand.hbm [shape: f32[1,1024], index: 10, kind: input, shape index: {}]   ;;  %s6666_s11 = inlined_call_operand.hbm [shape: f32[1,1024], index: 11, kind: input, shape index: {}]   ;;  %s6667_s12 = inlined_call_operand.hbm [shape: bf16[1024,128], index: 12, kind: input, shape index: {}]   ;;  %s6668_s13 = inlined_call_operand.hbm [shape: f32[1,128], index: 13, kind: input, shape index: {}]   ;;  %s6669_s14 = inlined_call_operand.hbm [shape: f32[8,128], index: 14, kind: output, shape index: {0}]   ;;  %s6670_s15 = inlined_call_operand.hbm [shape: f32[8,128], index: 15, kind: output, shape index: {1}]  }
   0x1   :  { %6683 = sst [smem:[#allocation44_spill]] %s6656_s1 }
   0x2   :  { %6684 = sst [smem:[#allocation45_spill]] %s6657_s2 }
   0x3   :  { %6685 = sst [smem:[#allocation46_spill]] %s6659_s4 }
   0x4   :  { %6686 = sst [smem:[#allocation47_spill]] %s6661_s6 }
   0x5   :  { %6687 = sst [smem:[#allocation48_spill]] %s6663_s8 }
   0x6   :  { %6688 = sst [smem:[#allocation49_spill]] %s6668_s13 }
   0x7   :  { %6689 = sst [smem:[#allocation50_spill]] %s6669_s14 }
   0x8   :  { %6690 = sst [smem:[#allocation51_spill]] %s6670_s15 }
   0x9   :  { %21 = vsyncpa [#allocation4], 0 }
   0xa   :  { %22 = vsyncpa [#allocation7], 0 }
   0xb   :  { %23 = vsyncpa [#allocation10], 0 }
   0xc   :  { %24 = vsyncpa [#allocation13], 0 }
   0xd   :  { %25 = vsyncpa [#allocation16], 0 }
   0xe   :  { %27 = vsyncpa [#allocation16 + $0x1], 0 }
   0xf   :  { %28 = vsyncpa [#allocation19], 0 }
  0x10   :  { %30 = vsyncpa [#allocation19 + $0x1], 0 }
  0x11   :  { %31 = vsyncpa [#allocation22], 0 }
  0x12   :  { %33 = vsyncpa [#allocation22 + $0x1], 0 }
  0x13   :  { %34 = vsyncpa [#allocation5], 0 }
  0x14   :  { %35 = vsyncpa [#allocation26], 0  ;;  %s5694_s18 = smov 0   ;;  %s5696_s19 = smov 0  }
  0x15   :  { %s5698_s20 = smov 0   ;;  %s5700_s21 = smov 0  }
  0x16 LB: > { %6691 = sst [smem:[#allocation37_spill]] %s5584_s19  ;;  %s5718_s25 = sadd.s32 4294967295, %s5592_s21   ;;  %s5592_s21 = sphi %s5700_s21, %s6720_s21   ;;  %s5588_s20 = sphi %s5698_s20, %s6723_s20   ;;  %s5584_s19 = sphi %s5696_s19, %s6722_s19   ;;  %s5580_s18 = sphi %s5694_s18, %s6721_s18  }
  0x17   : > { %6692 = sst [smem:[#allocation38_spill]] %s5588_s20  ;;  %p3610_p0 = scmp.ge.s32.totalorder %s5592_s21, 1 }
  0x18   : > { %s6693_s2 = sld [smem:[#allocation45_spill]]  ;;  %p230_p1 = scmp.eq.s32.totalorder %s5718_s25, 0 }
  0x19   : > { %6694 = sst [smem:[#allocation39_spill]] %s5718_s25  ;;  %p407_p2 = scmp.lt.s32.totalorder %s5592_s21, 5 }
  0x1a   : > { %p3611_p3 = scmp.ne.s32.totalorder %s5718_s25, 0  ;;  %s5594_s27 = smov [#allocation6]  }
  0x1b   : > { %p5724_p4 = pnand %p3610_p0, %p407_p2  ;;  %s436_s28 = sshll.u32 %s5594_s27, 4  ;;  %s437_s28 = int_to_ptr.vmem [resolvable:$true] %s436_s28 }
  0x1c   : > { %s6697_s4 = sld [smem:[#allocation46_spill]]  ;;  %s5595_s22 = smov [#allocation9]  }
  0x1d   : > { %s6695_s26 = scalar_select %p5724_p4, 1, 0 }
  0x1e   : > { %s434_s24 = sshll.u32 %s6693_s2, 4  ;;  %p4935_p5 = pneg %p5724_p4  ;;  %s435_s24 = int_to_ptr.hbm [resolvable:$true] %s434_s24 }
  0x1f   : > { %6696 = sst [smem:[#allocation40_spill]] %s6695_s26  ;;  %s462_s23 = sshll.u32 %s5595_s22, 4  ;;  %s463_s23 = int_to_ptr.vmem [resolvable:$true] %s462_s23 }
  0x20   : > { %p5735_p6 = pnand %p4935_p5, %p230_p1  ;;  %s6699_s6 = sld [smem:[#allocation47_spill]] }
  0x21   : > { %s6700_s13 = sld [smem:[#allocation49_spill]]  ;;  %s5596_s15 = smov [#allocation12]  }
  0x22   : > { %s460_s16 = sshll.u32 %s6697_s4, 4  ;;  %s486_s2 = sshll.u32 %s5596_s15, 4  ;;  %s461_s16 = int_to_ptr.hbm [resolvable:$true] %s460_s16  ;;  %s487_s2 = int_to_ptr.vmem [resolvable:$true] %s486_s2 }
  0x23   : > { %4941 = dma.hbm_to_vmem [thread:$0]  (!%p5735_p6), %s435_s24, 16, %s437_s28, [#allocation7]  }
  0x24   : > { %4947 = dma.hbm_to_vmem [thread:$0]  (!%p5735_p6), %s461_s16, 16, %s463_s23, [#allocation10]  }
  0x25   : > { %s5597_s24 = smov [#allocation23]   ;;  %s5754_s4 = sadd.s32 1, %s5592_s21  }
  0x26   : > { %s484_s29 = sshll.u32 %s6699_s6, 4  ;;  %s510_s28 = sshll.u32 %s5597_s24, 4  ;;  %s485_s29 = int_to_ptr.hbm [resolvable:$true] %s484_s29  ;;  %s511_s28 = int_to_ptr.vmem [resolvable:$true] %s510_s28 }
  0x27   : > { %s508_s22 = sshll.u32 %s6700_s13, 4  ;;  %6701 = sst [smem:[#allocation41_spill]] %s5754_s4  ;;  %s509_s22 = int_to_ptr.hbm [resolvable:$true] %s508_s22 }
  0x28   : > { %4953 = dma.hbm_to_vmem [thread:$0]  (!%p5735_p6), %s485_s29, 128, %s487_s2, [#allocation13]  }
  0x29   : > { %4959 = dma.hbm_to_vmem [thread:$0]  (!%p5735_p6), %s509_s22, 16, %s511_s28, [#allocation22]  }
  0x2a   : > { %s216_s16 = sadd.s32 1, %s5588_s20  ;;  %s213_s23 = ssub.s32 %s5592_s21, %s5754_s4 }
  0x2b   : > { %p223_p7 = scmp.ne.s32.totalorder %s5588_s20, %s5584_s19  ;;  %p214_p8 = scmp.eq.s32.totalorder %s213_s23, 0 }
  0x2c   : > { %p224_p9 = scmp.eq.s32.totalorder %s5592_s21, 0  ;;  %p229_p10 = scmp.ne.s32.totalorder %s5584_s19, %s5580_s18 }
  0x2d   : > { %p4984_p11 = scmp.lt.s32.totalorder %s5592_s21, 4  ;;  %s5775_s29 = sand.u32 1, %s5592_s21  }
  0x2e   : > { %s5766_s15 = scalar_select %p214_p8, %s5588_s20, %s216_s16  }
  0x2f   : > { %p225_p12 = por %p224_p9, %p223_p7  ;;  %p5770_p13 = por %p230_p1, %p229_p10 }
  0x30   : > { %6702 = sst [smem:[#allocation42_spill]] %s5766_s15  ;;  %s5778_s30 = sand.u32 1, %s5588_s20  }
  0x31   : > { %s6703_s27 = scalar_select %p5770_p13, 1, 0 }
  0x32   : > { %s3620_s22 = sshll.u32 %s5778_s30, 10  ;;  %s4639_s2 = sshll.u32 %s5592_s21, 3 }
  0x33   : > { %6704 = sst [smem:[#allocation43_spill]] %s6703_s27  ;;  %s525_s16 = scalar_lea.vmem [#allocation15], %s3620_s22 }
  0x34   : > { %s6705_s8 = sld [smem:[#allocation48_spill]]  ;;  %s533_s23 = sshll.u32 %s525_s16, 4  ;;  %s534_s23 = int_to_ptr.vmem [resolvable:$true] %s533_s23 }
  0x35   : > { %p5787_p0 = pnand %p4984_p11, %p225_p12 }
  0x37   : > { %p5794_p5 = pneg %p5787_p0 }
  0x3a   : > { %s530_s18 = scalar_lea.hbm %s6705_s8, %s4639_s2  ;;  %s5203_s28 = scalar_lea.hbm %s6705_s8, 4096 }
  0x3b   : > { %s531_s6 = sshll.u32 %s530_s18, 4  ;;  %s532_s6 = int_to_ptr.hbm [resolvable:$true] %s531_s6 }
  0x3c   : > { %s5196_s20 = sshra.s32 %s532_s6, 4  ;;  %s5197_s20 = int_to_ptr.hbm [resolvable:$true] %s5196_s20 }
  0x3d   : > { %s5198_s4 = scalar_lea.hbm %s5197_s20, 1024  ;;  %p5204_p9 = scmp.lt.s32.totalorder %s5197_s20, %s6705_s8 }
  0x3e   : > { %p5199_p2 = scmp.ne.s32.totalorder %s5197_s20, %s5198_s4  ;;  %p5205_p10 = scmp.lt.s32.totalorder %s5203_s28, %s5198_s4 }
  0x40   : > { %p5201_p7 = pnand %p5794_p5, %p5199_p2  ;;  %p5206_p11 = por %p5205_p10, %p5204_p9 }
  0x42   : > { %p5202_p8 = pneg %p5201_p7 }
  0x44   : > { %p5207_p12 = pnand %p5206_p11, %p5202_p8 }
  0x46   : > { %5210 = shalt.err (!%p5207_p12)
}
  0x47   : > { %s5598_s15 = smov 512   ;;  %s5599_s14 = smov 128  }
  0x48   : > { %s5600_s1 = smov 8   ;;  %s6708_s27 = scalar_lea.sflag [#allocation16], %s5775_s29 }
  0x49   : > { %4963 = dma.hbm_to_vmem [thread:$0]  (!%p5787_p0), %s532_s6, 16384, %s534_s23, %s6708_s27, %s5598_s15, %s5599_s14, %s5600_s1  }
  0x4a   : > { %s5811_s22 = sshll.u32 %s5778_s30, 1  ;;  %s5814_s20 = sshll.u32 %s5592_s21, 1 }
  0x4b   : > { %s570_s28 = scalar_lea.hbm %s6665_s10, %s5814_s20  ;;  %s566_s18 = scalar_lea.vmem [#allocation18], %s5811_s22 }
  0x4c   : > { %s574_s16 = sshll.u32 %s566_s18, 4  ;;  %s572_s8 = sshll.u32 %s570_s28, 4  ;;  %s575_s16 = int_to_ptr.vmem [resolvable:$true] %s574_s16  ;;  %s573_s8 = int_to_ptr.hbm [resolvable:$true] %s572_s8 }
  0x4d   : > { %s419_s26 = sshll.u32 %s6655_s0, 4  ;;  %s6682_s1 = scalar_lea.sflag [#allocation19], %s5775_s29  ;;  %s420_s26 = int_to_ptr.hbm [resolvable:$true] %s419_s26 }
  0x4e   : > { %s5226_s6 = sshra.s32 %s573_s8, 4  ;;  %s5233_s23 = scalar_lea.hbm %s6665_s10, 8  ;;  %s5227_s6 = int_to_ptr.hbm [resolvable:$true] %s5226_s6 }
  0x4f   : > { %s5228_s14 = scalar_lea.hbm %s5227_s6, 2  ;;  %p5234_p9 = scmp.lt.s32.totalorder %s5227_s6, %s6665_s10 }
  0x50   : > { %p5229_p2 = scmp.ne.s32.totalorder %s5227_s6, %s5228_s14  ;;  %p5235_p10 = scmp.lt.s32.totalorder %s5233_s23, %s5228_s14 }
  0x52   : > { %p5231_p7 = pnand %p5229_p2, %p5794_p5  ;;  %p5236_p11 = por %p5235_p10, %p5234_p9 }
  0x54   : > { %p5232_p8 = pneg %p5231_p7 }
  0x56   : > { %p5237_p12 = pnand %p5236_p11, %p5232_p8 }
  0x58   : > { %5240 = shalt.err (!%p5237_p12)
}
  0x59   : > { %4969 = dma.hbm_to_vmem [thread:$0]  (!%p5787_p0), %s573_s8, 32, %s575_s16, %s6682_s1  }
  0x5a   : > { %s5601_s19 = smov [#allocation3]   ;;  %s445_s15 = sshll.u32 %s6658_s3, 4  ;;  %s446_s15 = int_to_ptr.hbm [resolvable:$true] %s445_s15 }
  0x5b   : > { %s421_s25 = sshll.u32 %s5601_s19, 4  ;;  %s5602_s6 = smov [#allocation8]   ;;  %s422_s25 = int_to_ptr.vmem [resolvable:$true] %s421_s25 }
  0x5c   : > { %4938 = dma.hbm_to_vmem [thread:$0]  (!%p5735_p6), %s420_s26, 512, %s422_s25, [#allocation4]  }
  0x5d   : > { %s447_s14 = sshll.u32 %s5602_s6, 4  ;;  %s472_s8 = sshll.u32 %s6660_s5, 4  ;;  %s448_s14 = int_to_ptr.vmem [resolvable:$true] %s447_s14  ;;  %s473_s8 = int_to_ptr.hbm [resolvable:$true] %s472_s8 }
  0x5e   : > { %s5603_s16 = smov 576   ;;  %s5604_s4 = smov 36  }
  0x5f   : > { %4944 = dma.hbm_to_vmem [thread:$0]  (!%p5735_p6), %s446_s15, 4608, %s448_s14, [#allocation7], %s5603_s16, %s5603_s16, %s5604_s4  }
  0x60   : > { %s5605_s2 = smov [#allocation11]   ;;  %s496_s26 = sshll.u32 %s6662_s7, 4  ;;  %s497_s26 = int_to_ptr.hbm [resolvable:$true] %s496_s26 }
  0x61   : > { %s474_s19 = sshll.u32 %s5605_s2, 4  ;;  %s5606_s25 = smov [#allocation14]   ;;  %s475_s19 = int_to_ptr.vmem [resolvable:$true] %s474_s19 }
  0x62   : > { %4950 = dma.hbm_to_vmem [thread:$0]  (!%p5735_p6), %s473_s8, 128, %s475_s19, [#allocation10]  }
  0x63   : > { %s498_s6 = sshll.u32 %s5606_s25, 4  ;;  %s551_s1 = scalar_lea.hbm %s6664_s9, %s5814_s20  ;;  %s499_s6 = int_to_ptr.vmem [resolvable:$true] %s498_s6 }
  0x64   : > { %s553_s15 = sshll.u32 %s551_s1, 4  ;;  %s547_s14 = scalar_lea.vmem [#allocation17], %s5811_s22  ;;  %s554_s15 = int_to_ptr.hbm [resolvable:$true] %s553_s15 }
  0x65   : > { %4956 = dma.hbm_to_vmem [thread:$0]  (!%p5735_p6), %s497_s26, 128, %s499_s6, [#allocation13]  }
  0x66   : > { %s555_s16 = sshll.u32 %s547_s14, 4  ;;  %s5376_s4 = sshra.s32 %s554_s15, 4  ;;  %s556_s16 = int_to_ptr.vmem [resolvable:$true] %s555_s16  ;;  %s5377_s4 = int_to_ptr.hbm [resolvable:$true] %s5376_s4 }
  0x67   : > { %s5378_s2 = scalar_lea.hbm %s5377_s4, 2  ;;  %s5383_s28 = scalar_lea.hbm %s6664_s9, 8 }
  0x68   : > { %p5379_p2 = scmp.ne.s32.totalorder %s5377_s4, %s5378_s2  ;;  %p5384_p9 = scmp.lt.s32.totalorder %s5377_s4, %s6664_s9 }
  0x69   : > { %p5385_p6 = scmp.lt.s32.totalorder %s5383_s28, %s5378_s2 }
  0x6a   : > { %p5381_p7 = pnand %p5379_p2, %p5794_p5 }
  0x6b   : > { %p5386_p10 = por %p5385_p6, %p5384_p9 }
  0x6c   : > { %p5382_p8 = pneg %p5381_p7 }
  0x6e   : > { %p5387_p11 = pnand %p5386_p10, %p5382_p8 }
  0x70   : > { %5390 = shalt.err (!%p5387_p11)
}
  0x71   : > { %s6709_s17 = scalar_lea.sflag [#allocation16], %s5775_s29  ;;  %s589_s6 = scalar_lea.hbm %s6666_s11, %s5814_s20 }
  0x72   : > { %4966 = dma.hbm_to_vmem [thread:$0]  (!%p5787_p0), %s554_s15, 32, %s556_s16, %s6709_s17  }
  0x73   : > { %s585_s27 = scalar_lea.vmem [#allocation20], %s5811_s22  ;;  %s591_s14 = sshll.u32 %s589_s6, 4  ;;  %s592_s14 = int_to_ptr.hbm [resolvable:$true] %s591_s14 }
  0x74   : > { %s593_s23 = sshll.u32 %s585_s27, 4  ;;  %s5406_s4 = sshra.s32 %s592_s14, 4  ;;  %s594_s23 = int_to_ptr.vmem [resolvable:$true] %s593_s23  ;;  %s5407_s4 = int_to_ptr.hbm [resolvable:$true] %s5406_s4 }
  0x75   : > { %s5408_s2 = scalar_lea.hbm %s5407_s4, 2  ;;  %s5413_s15 = scalar_lea.hbm %s6666_s11, 8 }
  0x76   : > { %p5409_p12 = scmp.ne.s32.totalorder %s5407_s4, %s5408_s2  ;;  %p5414_p8 = scmp.lt.s32.totalorder %s5407_s4, %s6666_s11 }
  0x77   : > { %p5415_p9 = scmp.lt.s32.totalorder %s5413_s15, %s5408_s2 }
  0x78   : > { %p5411_p2 = pnand %p5409_p12, %p5794_p5 }
  0x79   : > { %p5416_p6 = por %p5415_p9, %p5414_p8 }
  0x7a   : > { %p5412_p7 = pneg %p5411_p2 }
  0x7c   : > { %p5417_p10 = pnand %p5416_p6, %p5412_p7 }
  0x7e   : > { %5420 = shalt.err (!%p5417_p10)
}
  0x7f   : > { %s6710_s22 = scalar_lea.sflag [#allocation19], %s5775_s29  ;;  %s3629_s20 = sshll.u32 %s5778_s30, 7 }
  0x80   : > { %4972 = dma.hbm_to_vmem [thread:$0]  (!%p5787_p0), %s592_s14, 32, %s594_s23, %s6710_s22  }
  0x81   : > { %s4640_s18 = sshll.u32 %s5592_s21, 7  ;;  %s604_s6 = scalar_lea.vmem [#allocation21], %s3629_s20 }
  0x82   : > { %s609_s1 = scalar_lea.hbm %s6667_s12, %s4640_s18  ;;  %s612_s27 = sshll.u32 %s604_s6, 4  ;;  %s613_s27 = int_to_ptr.vmem [resolvable:$true] %s612_s27 }
  0x83   : > { %s610_s26 = sshll.u32 %s609_s1, 4  ;;  %s601_s4 = scalar_lea.sflag [#allocation22], %s5775_s29  ;;  %s611_s26 = int_to_ptr.hbm [resolvable:$true] %s610_s26 }
  0x84   : > { %s5436_s2 = sshra.s32 %s611_s26, 4  ;;  %s5443_s21 = scalar_lea.hbm %s6667_s12, 512  ;;  %s5437_s2 = int_to_ptr.hbm [resolvable:$true] %s5436_s2 }
  0x85   : > { %s5438_s8 = scalar_lea.hbm %s5437_s2, 128  ;;  %p5444_p7 = scmp.lt.s32.totalorder %s5437_s2, %s6667_s12 }
  0x86   : > { %p5439_p11 = scmp.ne.s32.totalorder %s5437_s2, %s5438_s8  ;;  %p5445_p8 = scmp.lt.s32.totalorder %s5443_s21, %s5438_s8 }
  0x88   : > { %p5441_p12 = pnand %p5439_p11, %p5794_p5  ;;  %p5446_p9 = por %p5445_p8, %p5444_p7 }
  0x8a   : > { %p5442_p2 = pneg %p5441_p12 }
  0x8c   : > { %p5447_p6 = pnand %p5446_p9, %p5442_p2 }
  0x8e   : > { %5450 = shalt.err (!%p5447_p6)
}
  0x8f   : > { %s5607_s29 = smov 64   ;;  %s5608_s15 = smov 4  }
  0x90   : > { %4975 = dma.hbm_to_vmem [thread:$0]  (!%p5787_p0), %s611_s26, 2048, %s613_s27, %s601_s4, %s5607_s29, %s5607_s29, %s5608_s15  }
  0x91   : > { %624 = sbr.rel (%p5724_p4) target bundleno = 1104 (0x450), region = 76  ;;  %s6712_s16 = sld [smem:[#allocation39_spill]] (!%p5724_p4) }
  0x96   : > { %5539 = dma.done.wait (%p230_p1), [#allocation4], 512  }
  0x97   : > { %5541 = vsyncadd (%p230_p1), [#allocation4], 4294966784 }
  0x98   : > { %5543 = dma.done.wait (%p230_p1), [#allocation7], 4624  }
  0x99   : > { %5545 = vsyncadd (%p230_p1), [#allocation7], 4294962672 }
  0x9a   : > { %5547 = dma.done.wait (%p230_p1), [#allocation10], 144  }
  0x9b   : > { %5549 = vsyncadd (%p230_p1), [#allocation10], 4294967152 }
  0x9c   : > { %5551 = dma.done.wait (%p230_p1), [#allocation13], 256  }
  0x9d   : > { %5553 = vsyncadd (%p230_p1), [#allocation13], 4294967040  ;;  %s6713_s13 = sld [smem:[#allocation37_spill]]  ;;  %s661_s22 = sand.u32 1, %s6712_s16  }
  0x9e   : > { %s662_s25 = scalar_lea.sflag [#allocation16], %s661_s22 }
  0xa3   : > { %s663_s20 = sand.u32 1, %s6713_s13  }
  0xa4   : > { %s3640_s18 = sshll.u32 %s663_s20, 10 }
  0xa5   : > { %s5924_s17 = scalar_lea.vmem [#allocation15], %s3640_s18 }
  0xa6   : > { %5555 = dma.done.wait (%p5770_p13), %s662_s25, 16416  }
  0xa7   : > { %5557 = vsyncadd (%p5770_p13), %s662_s25, 4294950880  ;;  %s5930_s1 = sshll.u32 %s663_s20, 1  ;;  %s682_s6 = scalar_lea.sflag [#allocation19], %s661_s22 }
  0xa8   : > { %s675_s26 = scalar_lea.vmem [#allocation17], %s5930_s1  ;;  %s685_s27 = scalar_lea.vmem [#allocation18], %s5930_s1 }
  0xa9   : > { %5559 = dma.done.wait (%p5770_p13), %s682_s6, 64  }
  0xaa   : > { %5561 = vsyncadd (%p5770_p13), %s682_s6, 4294967232  ;;  %s3644_s4 = sshll.u32 %s663_s20, 7  ;;  %s695_s2 = scalar_lea.vmem [#allocation20], %s5930_s1 }
  0xab   : > { %s702_s8 = scalar_lea.sflag [#allocation22], %s661_s22  ;;  %s5939_s23 = scalar_lea.vmem [#allocation21], %s3644_s4 }
  0xac   : > { %5563 = dma.done.wait (%p5770_p13), %s702_s8, 2048  }
  0xad   : > { %5565 = vsyncadd (%p5770_p13), %s702_s8, 4294965248 }
  0xae   : > { %5567 = dma.done.wait (%p230_p1), [#allocation22], 16  }
  0xaf   : > { %5569 = vsyncadd (%p230_p1), [#allocation22], 4294967280  ;;  %782 = sbr.rel (%p3611_p3) target bundleno = 618 (0x26a), region = 132  ;;  %s6715_s14 = sld [smem:[#allocation44_spill]] (!%p3611_p3) }
  0xb4   : > { %v784_v28 = vld [vmem:[#allocation3 + $0x8] sm:$0xff]  ;;  %v783_v29 = vld [vmem:[#allocation3] sm:$0xff]  ;;  %vm1660_vm0 = vcmask 523264  }
  0xb5   : > { %v4648_v0 = vld [vmem:[%s6715_s14 + $0x38] sm:$0xff]  ;;  %v4647_v4 = vld [vmem:[%s6715_s14 + $0x30] sm:$0xff]  ;;  %v4646_v8 = vld [vmem:[%s6715_s14 + $0x28] sm:$0xff]  ;;  %v925_v32 = vunpack.c.l.b16 %v784_v28  ;;  %v923_v33 = vunpack.c.l.b16 %v783_v29  ;;  %v926_v36 = vunpack.c.h.b16 %v784_v28  ;;  %v924_v37 = vunpack.c.h.b16 %v783_v29 }
  0xb6   : > { %v4656_v1 = vld [vmem:[%s6715_s14 + $0x78] sm:$0xff]  ;;  %1331 = vmatpush.bf16.msra.mxu0 %v4648_v0  ;;  %v4655_v5 = vld [vmem:[%s6715_s14 + $0x70] sm:$0xff]  ;;  %v4654_v9 = vld [vmem:[%s6715_s14 + $0x68] sm:$0xff] }
  0xb7   : > { %v4664_v2 = vld [vmem:[%s6715_s14 + $0xb8] sm:$0xff]  ;;  %1344 = vmatpush.bf16.msra.mxu1 %v4656_v1  ;;  %v4663_v6 = vld [vmem:[%s6715_s14 + $0xb0] sm:$0xff]  ;;  %v4662_v10 = vld [vmem:[%s6715_s14 + $0xa8] sm:$0xff]  ;;  %v933_v42 = vpack.c.b16 %v925_v32, %v925_v32  ;;  %v931_v43 = vpack.c.b16 %v923_v33, %v923_v33  ;;  %v934_v44 = vpack.c.b16 %v926_v36, %v926_v36  ;;  %v932_v45 = vpack.c.b16 %v924_v37, %v924_v37 }
  0xb8   : > { %v4672_v3 = vld [vmem:[%s6715_s14 + $0xf8] sm:$0xff]  ;;  %1357 = vmatpush.bf16.msra.mxu2 %v4664_v2  ;;  %v4671_v7 = vld [vmem:[%s6715_s14 + $0xf0] sm:$0xff]  ;;  %v4670_v11 = vld [vmem:[%s6715_s14 + $0xe8] sm:$0xff] }
  0xb9   : > { %1370 = vmatpush.bf16.msra.mxu3 %v4672_v3  ;;  %v4645_v12 = vld [vmem:[%s6715_s14 + $0x20] sm:$0xff]  ;;  %v4644_v16 = vld [vmem:[%s6715_s14 + $0x18] sm:$0xff]  ;;  %v4643_v20 = vld [vmem:[%s6715_s14 + $0x10] sm:$0xff] }
  0xba   : > { %1332 = vmatpush.bf16.msra.mxu0 %v4647_v4  ;;  %v4653_v13 = vld [vmem:[%s6715_s14 + $0x60] sm:$0xff]  ;;  %v4652_v17 = vld [vmem:[%s6715_s14 + $0x58] sm:$0xff]  ;;  %v4651_v21 = vld [vmem:[%s6715_s14 + $0x50] sm:$0xff] }
  0xbb   : > { %1345 = vmatpush.bf16.msra.mxu1 %v4655_v5  ;;  %v4661_v14 = vld [vmem:[%s6715_s14 + $0xa0] sm:$0xff]  ;;  %v4660_v18 = vld [vmem:[%s6715_s14 + $0x98] sm:$0xff]  ;;  %v4659_v22 = vld [vmem:[%s6715_s14 + $0x90] sm:$0xff] }
  0xbc   : > { %1358 = vmatpush.bf16.msra.mxu2 %v4663_v6  ;;  %v4669_v15 = vld [vmem:[%s6715_s14 + $0xe0] sm:$0xff]  ;;  %v4668_v19 = vld [vmem:[%s6715_s14 + $0xd8] sm:$0xff]  ;;  %v4667_v23 = vld [vmem:[%s6715_s14 + $0xd0] sm:$0xff] }
  0xbd   : > { %1371 = vmatpush.bf16.msra.mxu3 %v4671_v7  ;;  %v4642_v24 = vld [vmem:[%s6715_s14 + $0x8] sm:$0xff]  ;;  %v4641_v30 = vld [vmem:[%s6715_s14] sm:$0xff]  ;;  %v4680_v38 = vld [vmem:[%s6715_s14 + $0x138] sm:$0xff] }
  0xbe   : > { %1333 = vmatpush.bf16.msra.mxu0 %v4646_v8  ;;  %v4650_v25 = vld [vmem:[%s6715_s14 + $0x48] sm:$0xff]  ;;  %v4649_v31 = vld [vmem:[%s6715_s14 + $0x40] sm:$0xff]  ;;  %v4688_v39 = vld [vmem:[%s6715_s14 + $0x178] sm:$0xff] }
  0xbf   : > { %1346 = vmatpush.bf16.msra.mxu1 %v4654_v9  ;;  %v4658_v26 = vld [vmem:[%s6715_s14 + $0x88] sm:$0xff]  ;;  %v4657_v34 = vld [vmem:[%s6715_s14 + $0x80] sm:$0xff]  ;;  %v4696_v40 = vld [vmem:[%s6715_s14 + $0x1b8] sm:$0xff] }
  0xc0   : > { %1359 = vmatpush.bf16.msra.mxu2 %v4662_v10  ;;  %v4666_v27 = vld [vmem:[%s6715_s14 + $0xc8] sm:$0xff]  ;;  %v4665_v35 = vld [vmem:[%s6715_s14 + $0xc0] sm:$0xff]  ;;  %v4704_v41 = vld [vmem:[%s6715_s14 + $0x1f8] sm:$0xff] }
  0xc1   : > { %1372 = vmatpush.bf16.msra.mxu3 %v4670_v11  ;;  %v4679_v46 = vld [vmem:[%s6715_s14 + $0x130] sm:$0xff]  ;;  %v4678_v50 = vld [vmem:[%s6715_s14 + $0x128] sm:$0xff]  ;;  %v4677_v54 = vld [vmem:[%s6715_s14 + $0x120] sm:$0xff] }
  0xc2   : > { %1334 = vmatpush.bf16.msra.mxu0 %v4645_v12  ;;  %v4687_v47 = vld [vmem:[%s6715_s14 + $0x170] sm:$0xff]  ;;  %v4686_v51 = vld [vmem:[%s6715_s14 + $0x168] sm:$0xff]  ;;  %v4685_v55 = vld [vmem:[%s6715_s14 + $0x160] sm:$0xff] }
  0xc3   : > { %1347 = vmatpush.bf16.msra.mxu1 %v4653_v13  ;;  %v4695_v48 = vld [vmem:[%s6715_s14 + $0x1b0] sm:$0xff]  ;;  %v4694_v52 = vld [vmem:[%s6715_s14 + $0x1a8] sm:$0xff]  ;;  %v4693_v56 = vld [vmem:[%s6715_s14 + $0x1a0] sm:$0xff] }
  0xc4   : > { %1360 = vmatpush.bf16.msra.mxu2 %v4661_v14  ;;  %v4703_v49 = vld [vmem:[%s6715_s14 + $0x1f0] sm:$0xff]  ;;  %v4702_v53 = vld [vmem:[%s6715_s14 + $0x1e8] sm:$0xff]  ;;  %v4701_v57 = vld [vmem:[%s6715_s14 + $0x1e0] sm:$0xff] }
  0xc5   : > { %1373 = vmatpush.bf16.msra.mxu3 %v4669_v15  ;;  %v4676_v58 = vld [vmem:[%s6715_s14 + $0x118] sm:$0xff]  ;;  %v4675_v62 = vld [vmem:[%s6715_s14 + $0x110] sm:$0xff]  ;;  %v4674_v2 = vld [vmem:[%s6715_s14 + $0x108] sm:$0xff] }
  0xc6   : > { %1335 = vmatpush.bf16.msra.mxu0 %v4644_v16  ;;  %v4684_v59 = vld [vmem:[%s6715_s14 + $0x158] sm:$0xff]  ;;  %v4683_v63 = vld [vmem:[%s6715_s14 + $0x150] sm:$0xff]  ;;  %v4682_v3 = vld [vmem:[%s6715_s14 + $0x148] sm:$0xff] }
  0xc7   : > { %1348 = vmatpush.bf16.msra.mxu1 %v4652_v17  ;;  %v4692_v60 = vld [vmem:[%s6715_s14 + $0x198] sm:$0xff]  ;;  %v4691_v0 = vld [vmem:[%s6715_s14 + $0x190] sm:$0xff]  ;;  %v4690_v5 = vld [vmem:[%s6715_s14 + $0x188] sm:$0xff] }
  0xc8   : > { %1361 = vmatpush.bf16.msra.mxu2 %v4660_v18  ;;  %v4700_v61 = vld [vmem:[%s6715_s14 + $0x1d8] sm:$0xff]  ;;  %v4699_v1 = vld [vmem:[%s6715_s14 + $0x1d0] sm:$0xff]  ;;  %v4698_v6 = vld [vmem:[%s6715_s14 + $0x1c8] sm:$0xff] }
  0xc9   : > { %1374 = vmatpush.bf16.msra.mxu3 %v4668_v19  ;;  %v785_v4 = vld [vmem:[#allocation3 + $0x10] sm:$0xff]  ;;  %v786_v7 = vld [vmem:[#allocation3 + $0x18] sm:$0xff]  ;;  %v4673_v10 = vld [vmem:[%s6715_s14 + $0x100] sm:$0xff] }
  0xca   : > { %1336 = vmatpush.bf16.msra.mxu0 %v4643_v20  ;;  %v927_v8 = vunpack.c.l.b16 %v785_v4  ;;  %v928_v9 = vunpack.c.h.b16 %v785_v4  ;;  %v4681_v11 = vld [vmem:[%s6715_s14 + $0x140] sm:$0xff]  ;;  %v929_v12 = vunpack.c.l.b16 %v786_v7  ;;  %v930_v13 = vunpack.c.h.b16 %v786_v7  ;;  %v4013_v20 = vld [vmem:[#allocation8 + $0xd8] sm:$0xf]  ;;  %v3977_v32 = vld [vmem:[#allocation8 + $0x90] sm:$0xf] }
  0xcb   : > { %1349 = vmatpush.bf16.msra.mxu1 %v4651_v21  ;;  %v4689_v14 = vld [vmem:[%s6715_s14 + $0x180] sm:$0xff]  ;;  %v4727_v33 = vld [vmem:[#allocation8 + $0xb0] sm:$0xf0]  ;;  %v3979_v36 = vld [vmem:[#allocation8 + $0xb4] sm:$0xf0] }
  0xcc   : > { %1362 = vmatpush.bf16.msra.mxu2 %v4659_v22  ;;  %v4697_v15 = vld [vmem:[%s6715_s14 + $0x1c0] sm:$0xff]  ;;  %v935_v16 = vpack.c.b16 %v927_v8, %v927_v8  ;;  %v936_v17 = vpack.c.b16 %v928_v9, %v928_v9  ;;  %v937_v18 = vpack.c.b16 %v929_v12, %v929_v12  ;;  %v938_v19 = vpack.c.b16 %v930_v13, %v930_v13  ;;  %v3985_v37 = vld [vmem:[#allocation8 + $0x98] sm:$0xf]  ;;  %v4734_v12 = vld [vmem:[#allocation8 + $0xec] sm:$0xf] }
  0xcd   : > { %1375 = vmatpush.bf16.msra.mxu3 %v4667_v23  ;;  %v4736_v21 = vld [vmem:[#allocation8 + $0xf8] sm:$0xf0]  ;;  %v4733_v29 = vld [vmem:[#allocation8 + $0xe4] sm:$0xf] }
  0xce   : > { %1337 = vmatpush.bf16.msra.mxu0 %v4642_v24  ;;  %v4732_v22 = vld [vmem:[#allocation8 + $0xdc] sm:$0xf]  ;;  %v4014_v23 = vor.u32 %v4736_v21, %v4013_v20  ;;  %v4015_v24 = vld [vmem:[#allocation8 + $0xfc] sm:$0xf0]  ;;  %v4735_v20 = vld [vmem:[#allocation8 + $0xf4] sm:$0xf] }
  0xcf   : > { %1350 = vmatpush.bf16.msra.mxu1 %v4650_v25  ;;  %v4021_v25 = vld [vmem:[#allocation8 + $0xe0] sm:$0xf]  ;;  %v5049_v13 = vld [vmem:[#allocation6] ss:$0 sm:$0xff]  ;;  %v4039_v21 = vld [vmem:[#allocation8 + $0x114] sm:$0xf0] }
  0xd0   : > { %1363 = vmatpush.bf16.msra.mxu2 %v4658_v26  ;;  %v4737_v26 = vld [vmem:[#allocation8 + $0x100] sm:$0xf0] }
  0xd1   : > { %1376 = vmatpush.bf16.msra.mxu3 %v4666_v27  ;;  %v4018_v27 = vor.u32 %v4732_v22, %v4015_v24  ;;  %v4022_v28 = vor.u32 %v4737_v26, %v4021_v25  ;;  %v3993_v22 = vld [vmem:[#allocation8 + $0xa0] sm:$0xf]  ;;  %v4729_v24 = vld [vmem:[#allocation8 + $0xc0] sm:$0xf0]  ;;  %v3995_v26 = vld [vmem:[#allocation8 + $0xc4] sm:$0xf0] }
  0xd2   : > { %1338 = vmatpush.bf16.msra.mxu0 %v4641_v30  ;;  %v4023_v30 = vld [vmem:[#allocation8 + $0x104] sm:$0xf0]  ;;  %v4725_v25 = vld [vmem:[#allocation8 + $0xa4] sm:$0xf] }
  0xd3   : > { %1351 = vmatpush.bf16.msra.mxu1 %v4649_v31  ;;  %v4026_v31 = vor.u32 %v4733_v29, %v4023_v30  ;;  %v3998_v29 = vor.u32 %v4725_v25, %v3995_v26  ;;  %v4001_v30 = vld [vmem:[#allocation8 + $0xa8] sm:$0xf]  ;;  %v5609_v26 = vmov 8.0  }
  0xd4   : > { %1364 = vmatpush.bf16.msra.mxu2 %v4657_v34  ;;  %v4723_v34 = vld [vmem:[#allocation8 + $0x94] sm:$0xf]  ;;  %5051 = vrcp.f32 %v5609_v26 }
  0xd5   : > { %1377 = vmatpush.bf16.msra.mxu3 %v4665_v35  ;;  %1339 = vmatmul.bf16.vlgmr.msra.gmra.mxu0 %v931_v43  ;;  %v3978_v35 = vor.u32 %v4727_v33, %v3977_v32  ;;  %v4726_v32 = vld [vmem:[#allocation8 + $0xac] sm:$0xf] }
  0xd6   : > { %1383 = vmatpush.bf16.msrb.mxu0 %v4680_v38  ;;  %1352 = vmatmul.bf16.vlgmr.msra.gmra.mxu1 %v932_v45  ;;  %v4728_v38 = vld [vmem:[#allocation8 + $0xb8] sm:$0xf0]  ;;  %v3941_v45 = vld [vmem:[#allocation8 + $0x48] sm:$0xf] }
  0xd7   : > { %1396 = vmatpush.bf16.msrb.mxu1 %v4688_v39  ;;  %1365 = vmatmul.bf16.vlgmr.msra.gmra.mxu2 %v933_v42  ;;  %v3982_v39 = vor.u32 %v4723_v34, %v3979_v36  ;;  %v3987_v42 = vld [vmem:[#allocation8 + $0xbc] sm:$0xf0]  ;;  %v3957_v36 = vld [vmem:[#allocation8 + $0x58] sm:$0xf] }
  0xd8   : > { %1409 = vmatpush.bf16.msrb.mxu2 %v4696_v40  ;;  %1378 = vmatmul.bf16.vlgmr.msra.gmra.mxu3 %v934_v44  ;;  %v3986_v40 = vor.u32 %v4728_v38, %v3985_v37  ;;  %v4720_v37 = vld [vmem:[#allocation8 + $0x78] sm:$0xf0] }
  0xd9   : > { %1422 = vmatpush.bf16.msrb.mxu3 %v4704_v41  ;;  %v4724_v41 = vld [vmem:[#allocation8 + $0x9c] sm:$0xf] }
  0xda   : > { %1384 = vmatpush.bf16.msrb.mxu0 %v4679_v46  ;;  %v3990_v44 = vor.u32 %v4724_v41, %v3987_v42  ;;  %v4718_v46 = vld [vmem:[#allocation8 + $0x68] sm:$0xf0]  ;;  %v3965_v41 = vld [vmem:[#allocation8 + $0x60] sm:$0xf] }
  0xdb   : > { %1397 = vmatpush.bf16.msrb.mxu1 %v4687_v47 }
  0xdc   : > { %1410 = vmatpush.bf16.msrb.mxu2 %v4695_v48  ;;  %v3942_v48 = vor.u32 %v4718_v46, %v3941_v45  ;;  %v4721_v45 = vld [vmem:[#allocation8 + $0x80] sm:$0xf0] }
  0xdd   : > { %1423 = vmatpush.bf16.msrb.mxu3 %v4703_v49  ;;  %v4714_v49 = vld [vmem:[#allocation8 + $0x4c] sm:$0xf]  ;;  %v4717_v46 = vld [vmem:[#allocation8 + $0x64] sm:$0xf] }
  0xde   : > { %1385 = vmatpush.bf16.msrb.mxu0 %v4678_v50  ;;  %v3943_v50 = vld [vmem:[#allocation8 + $0x6c] sm:$0xf0] }
  0xdf   : > { %1398 = vmatpush.bf16.msrb.mxu1 %v4686_v51  ;;  %v3949_v51 = vld [vmem:[#allocation8 + $0x50] sm:$0xf] }
  0xe0   : > { %1411 = vmatpush.bf16.msrb.mxu2 %v4694_v52  ;;  %v3946_v52 = vor.u32 %v4714_v49, %v3943_v50  ;;  %v3966_v50 = vor.u32 %v4721_v45, %v3965_v41 }
  0xe1   : > { %1424 = vmatpush.bf16.msrb.mxu3 %v4702_v53  ;;  %v4719_v53 = vld [vmem:[#allocation8 + $0x70] sm:$0xf0] }
  0xe2   : > { %1386 = vmatpush.bf16.msrb.mxu0 %v4677_v54  ;;  %v4715_v54 = vld [vmem:[#allocation8 + $0x54] sm:$0xf] }
  0xe3   : > { %1399 = vmatpush.bf16.msrb.mxu1 %v4685_v55  ;;  %v3951_v55 = vld [vmem:[#allocation8 + $0x74] sm:$0xf0] }
  0xe4   : > { %1412 = vmatpush.bf16.msrb.mxu2 %v4693_v56  ;;  %v3950_v56 = vor.u32 %v4719_v53, %v3949_v51  ;;  %v3921_v51 = vld [vmem:[#allocation8 + $0x10] sm:$0xf]  ;;  %v4707_v53 = vld [vmem:[#allocation8 + $0x14] sm:$0xf] }
  0xe5   : > { %1425 = vmatpush.bf16.msrb.mxu3 %v4701_v57  ;;  %v3954_v57 = vor.u32 %v4715_v54, %v3951_v55  ;;  %v3923_v55 = vld [vmem:[#allocation8 + $0x34] sm:$0xf0] }
  0xe6   : > { %1387 = vmatpush.bf16.msrb.mxu0 %v4676_v58  ;;  %v3905_v58 = vld [vmem:[#allocation8] sm:$0xf] }
  0xe7   : > { %1400 = vmatpush.bf16.msrb.mxu1 %v4684_v59  ;;  %v4709_v59 = vld [vmem:[#allocation8 + $0x20] sm:$0xf0] }
  0xe8   : > { %1413 = vmatpush.bf16.msrb.mxu2 %v4692_v60  ;;  %v4705_v60 = vld [vmem:[#allocation8 + $0x4] sm:$0xf] }
  0xe9   : > { %1426 = vmatpush.bf16.msrb.mxu3 %v4700_v61 }
  0xea   : > { %1388 = vmatpush.bf16.msrb.mxu0 %v4675_v62  ;;  %v3906_v62 = vor.u32 %v4709_v59, %v3905_v58  ;;  %v4708_v58 = vld [vmem:[#allocation8 + $0x1c] sm:$0xf]  ;;  %v3931_v59 = vld [vmem:[#allocation8 + $0x3c] sm:$0xf0] }
  0xeb   : > { %1401 = vmatpush.bf16.msrb.mxu1 %v4683_v63  ;;  %v3907_v63 = vld [vmem:[#allocation8 + $0x24] sm:$0xf0] }
  0xec   : > { %1414 = vmatpush.bf16.msrb.mxu2 %v4691_v0  ;;  %v3913_v0 = vld [vmem:[#allocation8 + $0x8] sm:$0xf] }
  0xed   : > { %1427 = vmatpush.bf16.msrb.mxu3 %v4699_v1  ;;  %v4710_v1 = vld [vmem:[#allocation8 + $0x28] sm:$0xf0] }
  0xee   : > { %1389 = vmatpush.bf16.msrb.mxu0 %v4674_v2  ;;  %v3914_v4 = vor.u32 %v4710_v1, %v3913_v0  ;;  %v3934_v0 = vor.u32 %v4708_v58, %v3931_v59 }
  0xef   : > { %1402 = vmatpush.bf16.msrb.mxu1 %v4682_v3  ;;  %v3910_v3 = vor.u32 %v4705_v60, %v3907_v63 }
  0xf0   : > { %1415 = vmatpush.bf16.msrb.mxu2 %v4690_v5  ;;  %v4706_v5 = vld [vmem:[#allocation8 + $0xc] sm:$0xf] }
  0xf1   : > { %1428 = vmatpush.bf16.msrb.mxu3 %v4698_v6  ;;  %v3915_v6 = vld [vmem:[#allocation8 + $0x2c] sm:$0xf0] }
  0xf2   : > { %1390 = vmatpush.bf16.msrb.mxu0 %v4673_v10  ;;  %v3918_v8 = vor.u32 %v4706_v5, %v3915_v6  ;;  %v4029_v10 = vld [vmem:[#allocation8 + $0xe8] sm:$0xf] }
  0xf3   : > { %1403 = vmatpush.bf16.msrb.mxu1 %v4681_v11  ;;  %v4738_v11 = vld [vmem:[#allocation8 + $0x108] sm:$0xf0] }
  0xf4   : > { %1416 = vmatpush.bf16.msrb.mxu2 %v4689_v14  ;;  %v4030_v14 = vor.u32 %v4738_v11, %v4029_v10 }
  0xf5   : > { %1429 = vmatpush.bf16.msrb.mxu3 %v4697_v15  ;;  %1391 = vmatmul.bf16.vlgmr.msrb.gmra.mxu0 %v935_v16  ;;  %v4031_v15 = vld [vmem:[#allocation8 + $0x10c] sm:$0xf0] }
  0xf6   : > { %1404 = vmatmul.bf16.vlgmr.msrb.gmra.mxu1 %v936_v17  ;;  %1668 = vmatpush.bf16.msra.mxu0 %v4014_v23  ;;  %v4037_v16 = vld [vmem:[#allocation8 + $0xf0] sm:$0xf]  ;;  %v4739_v17 = vld [vmem:[#allocation8 + $0x110] sm:$0xf0]  ;;  %v4042_v23 = vor.u32 %v4735_v20, %v4039_v21  ;;  %v3973_v20 = vld [vmem:[#allocation8 + $0x68] sm:$0xf] }
  0xf7   : > { %1417 = vmatmul.bf16.vlgmr.msrb.gmra.mxu2 %v937_v18  ;;  %1681 = vmatpush.bf16.msra.mxu1 %v4018_v27  ;;  %v4034_v18 = vor.u32 %v4734_v12, %v4031_v15  ;;  %v4045_v12 = vld [vmem:[#allocation8 + $0xf8] sm:$0xf]  ;;  %v4722_v21 = vld [vmem:[#allocation8 + $0x88] sm:$0xf0] }
  0xf8   : > { %1430 = vmatmul.bf16.vlgmr.msrb.gmra.mxu3 %v938_v19  ;;  %1694 = vmatpush.bf16.msra.mxu2 %v4022_v28  ;;  %v4038_v19 = vor.u32 %v4739_v17, %v4037_v16  ;;  %v3994_v28 = vor.u32 %v4729_v24, %v3993_v22  ;;  %v4009_v16 = vld [vmem:[#allocation8 + $0xb0] sm:$0xf]  ;;  %v4731_v17 = vld [vmem:[#allocation8 + $0xd0] sm:$0xf0]  ;;  %v3974_v22 = vor.u32 %v4722_v21, %v3973_v20  ;;  %v4713_v24 = vld [vmem:[#allocation8 + $0x40] sm:$0xf0] }
  0xf9   : > { %1707 = vmatpush.bf16.msra.mxu3 %v4026_v31  ;;  %v4730_v31 = vld [vmem:[#allocation8 + $0xc8] sm:$0xf0] }
  0xfa   : > { %1669 = vmatpush.bf16.msra.mxu0 %v3978_v35  ;;  %v4002_v34 = vor.u32 %v4730_v31, %v4001_v30  ;;  %v4003_v35 = vld [vmem:[#allocation8 + $0xcc] sm:$0xf0]  ;;  %v5050_v30 = vld [vmem:[#allocation9] ss:$0 sm:$0xff] }
  0xfb   : > { %1682 = vmatpush.bf16.msra.mxu1 %v3982_v39  ;;  %v4006_v38 = vor.u32 %v4726_v32, %v4003_v35  ;;  %v4716_v39 = vld [vmem:[#allocation8 + $0x5c] sm:$0xf] }
  0xfc   : > { %1695 = vmatpush.bf16.msra.mxu2 %v3986_v40  ;;  %v3959_v40 = vld [vmem:[#allocation8 + $0x7c] sm:$0xf0] }
  0xfd   : > { %1708 = vmatpush.bf16.msra.mxu3 %v3990_v44  ;;  %v3958_v44 = vor.u32 %v4720_v37, %v3957_v36  ;;  %v3962_v49 = vor.u32 %v4716_v39, %v3959_v40 }
  0xfe   : > { %1670 = vmatpush.bf16.msra.mxu0 %v3942_v48  ;;  %v3967_v48 = vld [vmem:[#allocation8 + $0x84] sm:$0xf0] }
  0xff   : > { %1683 = vmatpush.bf16.msra.mxu1 %v3946_v52  ;;  %v4711_v52 = vld [vmem:[#allocation8 + $0x30] sm:$0xf0]  ;;  %v3970_v54 = vor.u32 %v4717_v46, %v3967_v48 }
 0x100   : > { %1696 = vmatpush.bf16.msra.mxu2 %v3950_v56  ;;  %v3929_v56 = vld [vmem:[#allocation8 + $0x18] sm:$0xf]  ;;  %v3922_v60 = vor.u32 %v4711_v52, %v3921_v51 }
 0x101   : > { %1709 = vmatpush.bf16.msra.mxu3 %v3954_v57  ;;  %v4712_v57 = vld [vmem:[#allocation8 + $0x38] sm:$0xf0] }
 0x102   : > { %1671 = vmatpush.bf16.msra.mxu0 %v3906_v62  ;;  %v3926_v62 = vor.u32 %v4707_v53, %v3923_v55  ;;  %v3930_v63 = vor.u32 %v4712_v57, %v3929_v56 }
 0x103   : > { %1684 = vmatpush.bf16.msra.mxu1 %v3910_v3 }
 0x104   : > { %1697 = vmatpush.bf16.msra.mxu2 %v3914_v4 }
 0x105   : > { %1710 = vmatpush.bf16.msra.mxu3 %v3918_v8 }
 0x106   : > { %1720 = vmatpush.bf16.msrb.mxu0 %v4030_v14 }
 0x107   : > { %1733 = vmatpush.bf16.msrb.mxu1 %v4034_v18 }
 0x108   : > { %1746 = vmatpush.bf16.msrb.mxu2 %v4038_v19  ;;  %v4010_v19 = vor.u32 %v4731_v17, %v4009_v16 }
 0x109   : > { %1759 = vmatpush.bf16.msrb.mxu3 %v4042_v23  ;;  %v3937_v23 = vld [vmem:[#allocation8 + $0x20] sm:$0xf] }
 0x10a   : > { %1721 = vmatpush.bf16.msrb.mxu0 %v3994_v28  ;;  %v3938_v25 = vor.u32 %v4713_v24, %v3937_v23  ;;  %v6164_v28 = vld [vmem:[#allocation11] sm:$0xff] }
 0x10b   : > { %1734 = vmatpush.bf16.msrb.mxu1 %v3998_v29  ;;  %v1789_v31 = vperm.slane %v6164_v28, 0  ;;  %v1790_v39 = vperm.slane %v6164_v28, 1  ;;  %v1791_v40 = vperm.slane %v6164_v28, 2  ;;  %v1794_v16 = vperm.slane %v6164_v28, 5 }
 0x10c   : > { %1747 = vmatpush.bf16.msrb.mxu2 %v4002_v34  ;;  %v1795_v17 = vperm.slane %v6164_v28, 6 }
 0x10d   : > { %1760 = vmatpush.bf16.msrb.mxu3 %v4006_v38 }
 0x10e   : > { %1722 = vmatpush.bf16.msrb.mxu0 %v3958_v44 }
 0x10f   : > { %1735 = vmatpush.bf16.msrb.mxu1 %v3962_v49 }
 0x110   : > { %1748 = vmatpush.bf16.msrb.mxu2 %v3966_v50 }
 0x111   : > { %1761 = vmatpush.bf16.msrb.mxu3 %v3970_v54 }
 0x112   : > { %1723 = vmatpush.bf16.msrb.mxu0 %v3922_v60  ;;  %v1793_v60 = vperm.slane %v6164_v28, 4 }
 0x113   : > { %1736 = vmatpush.bf16.msrb.mxu1 %v3926_v62 }
 0x114   : > { %1749 = vmatpush.bf16.msrb.mxu2 %v3930_v63 }
 0x115   : > { %1762 = vmatpush.bf16.msrb.mxu3 %v3934_v0 }
 0x152   : > { %v6143_v43 = vpop.f32.mrf.mxu0 }
 0x153   : > { %v6145_v47 = vpop.f32.mrf.mxu1  ;;  %v1341_v42 = vadd.f32 %v5049_v13, %v6143_v43  ;;  %v4740_v13 = vld [vmem:[#allocation8 + $0x118] sm:$0xf0] }
 0x154   : > { %v4046_v15 = vor.u32 %v4740_v13, %v4045_v12 }
 0x155   : > { %v1354_v43 = vadd.f32 %v6145_v47, %v1341_v42 }
 0x15a   : > { %v6147_v61 = vpop.f32.mrf.mxu2  ;;  %v1342_v7 = vpop.f32.mrf.mxu0 }
 0x15b   : > { %v6149_v2 = vpop.f32.mrf.mxu3  ;;  %v1355_v9 = vpop.f32.mrf.mxu1  ;;  %v1367_v1 = vadd.f32 %v6147_v61, %v1354_v43  ;;  %v1792_v43 = vperm.slane %v6164_v28, 3 }
 0x15d   : > { %v1380_v3 = vadd.f32 %v6149_v2, %v1367_v1 }
 0x162   : > { %v1368_v27 = vpop.f32.mrf.mxu2 }
 0x163   : > { %v1381_v33 = vpop.f32.mrf.mxu3  ;;  %v5052_v27 = vpop.eup %5051 }
 0x164   : > { %v1864_v29 = vmul.f32 8.0, %v5052_v27  ;;  %vm1868_vm1 = vweird.f32 %v5052_v27 }
 0x166   : > { %v1865_v34 = vsub.f32 1.0, %v1864_v29 }
 0x168   : > { %v1866_v38 = vmul.f32 %v5052_v27, %v1865_v34 }
 0x16a   : > { %v1867_v46 = vadd.f32 %v5052_v27, %v1866_v38 }
 0x16c   : > { %v6169_v56 = vsel %vm1868_vm1, %v5052_v27, %v1867_v46 }
 0x172   : > { %v1392_v4 = vpop.f32.mrf.mxu0 }
 0x173   : > { %v1405_v5 = vpop.f32.mrf.mxu1  ;;  %v1393_v6 = vadd.f32 %v1392_v4, %v1380_v3 }
 0x175   : > { %v1406_v47 = vadd.f32 %v1405_v5, %v1393_v6 }
 0x17a   : > { %v1418_v7 = vpop.f32.mrf.mxu2  ;;  %v1394_v10 = vpop.f32.mrf.mxu0 }
 0x17b   : > { %v1431_v8 = vpop.f32.mrf.mxu3  ;;  %v1419_v9 = vadd.f32 %v1418_v7, %v1406_v47  ;;  %v1407_v11 = vpop.f32.mrf.mxu1 }
 0x17d   : > { %v1432_v14 = vadd.f32 %v1431_v8, %v1419_v9 }
 0x17f   : > { %v1435_v61 = vpack.c.bf16 %v1432_v14, %v1432_v14 }
 0x181   : > { %4047 = vmatmul.msk.bf16.vlgmr.msra.gmra.mxu0 %vm1660_vm0, %v1435_v61  ;;  %4048 = vmatmul.msk.bf16.vlgmr.msra.gmra.mxu1 %vm1660_vm0, %v1435_v61 }
 0x182   : > { %4049 = vmatmul.msk.bf16.vlgmr.msra.gmra.mxu2 %vm1660_vm0, %v1435_v61  ;;  %4050 = vmatmul.msk.bf16.vlgmr.msra.gmra.mxu3 %vm1660_vm0, %v1435_v61  ;;  %v1420_v2 = vpop.f32.mrf.mxu2 }
 0x183   : > { %v1433_v18 = vpop.f32.mrf.mxu3  ;;  %1772 = vmatpush.bf16.msra.mxu0 %v4046_v15 }
 0x187   : > { %1773 = vmatpush.bf16.msra.mxu0 %v4010_v19 }
 0x18b   : > { %1774 = vmatpush.bf16.msra.mxu0 %v3974_v22 }
 0x18f   : > { %1775 = vmatpush.bf16.msra.mxu0 %v3938_v25 }
 0x191   : > { %4051 = vmatmul.msk.bf16.vlgmr.msrb.gmra.mxu0 %vm1660_vm0, %v1435_v61  ;;  %4052 = vmatmul.msk.bf16.vlgmr.msrb.gmra.mxu1 %vm1660_vm0, %v1435_v61 }
 0x192   : > { %4053 = vmatmul.msk.bf16.vlgmr.msrb.gmra.mxu2 %vm1660_vm0, %v1435_v61  ;;  %4054 = vmatmul.msk.bf16.vlgmr.msrb.gmra.mxu3 %vm1660_vm0, %v1435_v61 }
 0x1a1   : > { %4055 = vmatmul.msk.bf16.vlgmr.msra.gmra.mxu0 %vm1660_vm0, %v1435_v61 }
 0x1fe   : > { %v1673_v32 = vpop.f32.mrf.mxu0  ;;  %v1686_v33 = vpop.f32.mrf.mxu1 }
 0x1ff   : > { %v1785_v35 = vadd.f32 %v5050_v30, %v1673_v32  ;;  %v1805_v36 = vadd.f32 %v1789_v31, %v1686_v33 }
 0x201   : > { %1786 = vst [vmem:[#allocation24] sm:$0xff] %v1785_v35  ;;  %v1815_v37 = vrot.slane %v1805_v36, 4 }
 0x203   : > { %v1816_v41 = vadd.f32 %v1815_v37, %v1805_v36 }
 0x205   : > { %v1817_v42 = vrot.slane %v1816_v41, 2  ;;  %v1699_v44 = vpop.f32.mrf.mxu2  ;;  %v1712_v45 = vpop.f32.mrf.mxu3 }
 0x206   : > { %v1806_v48 = vadd.f32 %v1790_v39, %v1699_v44  ;;  %v1807_v49 = vadd.f32 %v1791_v40, %v1712_v45  ;;  %v1675_v50 = vpop.f32.mrf.mxu0  ;;  %v1688_v51 = vpop.f32.mrf.mxu1 }
 0x207   : > { %v1818_v52 = vadd.f32 %v1817_v42, %v1816_v41 }
 0x208   : > { %v1821_v53 = vrot.slane %v1806_v48, 4  ;;  %v1827_v54 = vrot.slane %v1807_v49, 4 }
 0x209   : > { %v1819_v55 = vrot.slane %v1818_v52, 1 }
 0x20a   : > { %v1822_v57 = vadd.f32 %v1821_v53, %v1806_v48  ;;  %v1828_v58 = vadd.f32 %v1827_v54, %v1807_v49 }
 0x20b   : > { %v1820_v59 = vadd.f32 %v1819_v55, %v1818_v52 }
 0x20c   : > { %v1823_v62 = vrot.slane %v1822_v57, 2  ;;  %v1829_v63 = vrot.slane %v1828_v58, 2 }
 0x20d   : > { %v1870_v0 = vmul.f32 %v6169_v56, %v1820_v59  ;;  %v1701_v1 = vpop.f32.mrf.mxu2  ;;  %v1714_v3 = vpop.f32.mrf.mxu3 }
 0x20e   : > { %v1824_v4 = vadd.f32 %v1823_v62, %v1822_v57  ;;  %v1830_v5 = vadd.f32 %v1829_v63, %v1828_v58  ;;  %v1725_v6 = vpop.f32.mrf.mxu0  ;;  %v1738_v47 = vpop.f32.mrf.mxu1  ;;  %v1796_v62 = vperm.slane %v6164_v28, 7 }
 0x20f   : > { %v6174_v7 = vsub.f32 %v1805_v36, %v1870_v0  ;;  %v1808_v8 = vadd.f32 %v1792_v43, %v1725_v6  ;;  %v1809_v9 = vadd.f32 %v1793_v60, %v1738_v47 }
 0x210   : > { %v1825_v10 = vrot.slane %v1824_v4, 1  ;;  %v1831_v11 = vrot.slane %v1830_v5, 1 }
 0x211   : > { %v1886_v12 = vmul.f32 %v6174_v7, %v6174_v7  ;;  %v1833_v13 = vrot.slane %v1808_v8, 4  ;;  %v1839_v14 = vrot.slane %v1809_v9, 4 }
 0x212   : > { %v1826_v61 = vadd.f32 %v1825_v10, %v1824_v4  ;;  %v1832_v15 = vadd.f32 %v1831_v11, %v1830_v5 }
 0x213   : > { %v1894_v2 = vrot.slane %v1886_v12, 4  ;;  %v1834_v18 = vadd.f32 %v1833_v13, %v1808_v8  ;;  %v1840_v19 = vadd.f32 %v1839_v14, %v1809_v9 }
 0x214   : > { %v1871_v20 = vmul.f32 %v6169_v56, %v1826_v61  ;;  %v1872_v21 = vmul.f32 %v6169_v56, %v1832_v15 }
 0x215   : > { %v1895_v22 = vadd.f32 %v1894_v2, %v1886_v12  ;;  %v1835_v23 = vrot.slane %v1834_v18, 2  ;;  %v1841_v24 = vrot.slane %v1840_v19, 2  ;;  %v1751_v25 = vpop.f32.mrf.mxu2  ;;  %v1764_v26 = vpop.f32.mrf.mxu3 }
 0x216   : > { %v6182_v27 = vsub.f32 %v1806_v48, %v1871_v20  ;;  %v6184_v29 = vsub.f32 %v1807_v49, %v1872_v21  ;;  %v1810_v30 = vadd.f32 %v1794_v16, %v1751_v25  ;;  %v6186_v31 = vadd.f32 %v1795_v17, %v1764_v26  ;;  %v1727_v32 = vpop.f32.mrf.mxu0  ;;  %v1740_v33 = vpop.f32.mrf.mxu1 }
 0x217   : > { %v1896_v34 = vrot.slane %v1895_v22, 2  ;;  %v1836_v35 = vadd.f32 %v1835_v23, %v1834_v18  ;;  %v1842_v36 = vadd.f32 %v1841_v24, %v1840_v19 }
 0x218   : > { %v1887_v37 = vmul.f32 %v6182_v27, %v6182_v27  ;;  %v1888_v38 = vmul.f32 %v6184_v29, %v6184_v29  ;;  %v1845_v39 = vrot.slane %v1810_v30, 4  ;;  %v1851_v40 = vrot.slane %v6186_v31, 4 }
 0x219   : > { %v1897_v41 = vadd.f32 %v1896_v34, %v1895_v22  ;;  %v1837_v42 = vrot.slane %v1836_v35, 1  ;;  %v1843_v44 = vrot.slane %v1842_v36, 1 }
 0x21a   : > { %v1900_v45 = vrot.slane %v1887_v37, 4  ;;  %v1906_v46 = vrot.slane %v1888_v38, 4  ;;  %v1846_v48 = vadd.f32 %v1845_v39, %v1810_v30  ;;  %v1852_v55 = vadd.f32 %v1851_v40, %v6186_v31 }
 0x21b   : > { %v1898_v49 = vrot.slane %v1897_v41, 1  ;;  %v1838_v50 = vadd.f32 %v1837_v42, %v1836_v35  ;;  %v1844_v51 = vadd.f32 %v1843_v44, %v1842_v36 }
 0x21c   : > { %v1901_v52 = vadd.f32 %v1900_v45, %v1887_v37  ;;  %v1907_v53 = vadd.f32 %v1906_v46, %v1888_v38  ;;  %v1847_v54 = vrot.slane %v1846_v48, 2  ;;  %v1853_v12 = vrot.slane %v1852_v55, 2 }
 0x21d   : > { %v1899_v57 = vadd.f32 %v1898_v49, %v1897_v41  ;;  %v1873_v58 = vmul.f32 %v6169_v56, %v1838_v50  ;;  %v1874_v59 = vmul.f32 %v6169_v56, %v1844_v51  ;;  %v1753_v43 = vpop.f32.mrf.mxu2  ;;  %v1766_v60 = vpop.f32.mrf.mxu3  ;;  %v6228_v49 = vld [vmem:[#allocation12] sm:$0xff] }
 0x21e   : > { %v1902_v63 = vrot.slane %v1901_v52, 2  ;;  %v1908_v0 = vrot.slane %v1907_v53, 2  ;;  %v1848_v1 = vadd.f32 %v1847_v54, %v1846_v48  ;;  %v1777_v3 = vpop.f32.mrf.mxu0  ;;  %v1854_v17 = vadd.f32 %v1853_v12, %v1852_v55 }
 0x21f   : > { %v1942_v4 = vmul.f32 %v1899_v57, %v6169_v56  ;;  %v6198_v5 = vsub.f32 %v1808_v8, %v1873_v58  ;;  %v6200_v6 = vsub.f32 %v1809_v9, %v1874_v59  ;;  %v6208_v61 = vadd.f32 %v1796_v62, %v1777_v3 }
 0x220   : > { %v1903_v47 = vadd.f32 %v1902_v63, %v1901_v52  ;;  %v1909_v10 = vadd.f32 %v1908_v0, %v1907_v53  ;;  %v1849_v11 = vrot.slane %v1848_v1, 1  ;;  %v1855_v21 = vrot.slane %v1854_v17, 1  ;;  %v6238_v0 = vld [vmem:[#allocation14] sm:$0xff] }
 0x221   : > { %v6202_v13 = vadd.f32 1e-05, %v1942_v4  ;;  %v1889_v14 = vmul.f32 %v6198_v5, %v6198_v5  ;;  %v1890_v28 = vmul.f32 %v6200_v6, %v6200_v6  ;;  %v1857_v24 = vrot.slane %v6208_v61, 4 }
 0x222   : > { %v1904_v15 = vrot.slane %v1903_v47, 1  ;;  %v1910_v16 = vrot.slane %v1909_v10, 1  ;;  %v1850_v8 = vadd.f32 %v1849_v11, %v1848_v1  ;;  %v1856_v33 = vadd.f32 %v1855_v21, %v1854_v17 }
 0x223   : > { %5053 = vrsqrt.f32 %v6202_v13  ;;  %v1912_v9 = vrot.slane %v1889_v14, 4  ;;  %v1918_v2 = vrot.slane %v1890_v28, 4  ;;  %v1858_v45 = vadd.f32 %v1857_v24, %v6208_v61 }
 0x224   : > { %v1905_v18 = vadd.f32 %v1904_v15, %v1903_v47  ;;  %v1911_v19 = vadd.f32 %v1910_v16, %v1909_v10  ;;  %v1875_v20 = vmul.f32 %v6169_v56, %v1850_v8  ;;  %v1876_v40 = vmul.f32 %v6169_v56, %v1856_v33 }
 0x225   : > { %v1913_v22 = vadd.f32 %v1912_v9, %v1889_v14  ;;  %v1919_v23 = vadd.f32 %v1918_v2, %v1890_v28  ;;  %v1859_v53 = vrot.slane %v1858_v45, 2  ;;  %v2047_v43 = vperm.slane %v6228_v49, 0 }
 0x226   : > { %v1943_v25 = vmul.f32 %v1905_v18, %v6169_v56  ;;  %v1944_v26 = vmul.f32 %v1911_v19, %v6169_v56  ;;  %v6215_v32 = vsub.f32 %v1810_v30, %v1875_v20  ;;  %v1779_v34 = vpop.f32.mrf.mxu0  ;;  %v6231_v52 = vsub.f32 %v6186_v31, %v1876_v40 }
 0x227   : > { %v1914_v35 = vrot.slane %v1913_v22, 2  ;;  %v1920_v36 = vrot.slane %v1919_v23, 2  ;;  %v1860_v3 = vadd.f32 %v1859_v53, %v1858_v45  ;;  %vm1964_vm3 = vweird.f32 %v6202_v13 }
 0x228   : > { %v6217_v37 = vadd.f32 1e-05, %v1943_v25  ;;  %v6219_v38 = vadd.f32 1e-05, %v1944_v26  ;;  %v1891_v39 = vmul.f32 %v6215_v32, %v6215_v32  ;;  %v1892_v59 = vmul.f32 %v6231_v52, %v6231_v52 }
 0x229   : > { %v5054_v41 = vpop.eup %5053  ;;  %v1915_v42 = vadd.f32 %v1914_v35, %v1913_v22  ;;  %v1921_v44 = vadd.f32 %v1920_v36, %v1919_v23  ;;  %v2072_v16 = vperm.slane %v6238_v0, 0  ;;  %v2048_v17 = vperm.slane %v6228_v49, 1 }
 0x22a   : > { %v1959_v30 = vmul.f32 %v5054_v41, %v6202_v13  ;;  %5055 = vrsqrt.f32 %v6217_v37  ;;  %v1924_v51 = vrot.slane %v1891_v39, 4  ;;  %vm1965_vm2 = vweird.f32 %v5054_v41 }
 0x22b   : > { %5057 = vrsqrt.f32 %v6219_v38  ;;  %v1916_v46 = vrot.slane %v1915_v42, 1  ;;  %v1922_v48 = vrot.slane %v1921_v44, 1  ;;  %v1930_v12 = vrot.slane %v1892_v59, 4  ;;  %vm1966_vm4 = vmor %vm1964_vm3, %vm1965_vm2 }
 0x22c   : > { %v1960_v50 = vmul.f32 %v5054_v41, %v1959_v30  ;;  %v1925_v58 = vadd.f32 %v1924_v51, %v1891_v39  ;;  %v1861_v21 = vrot.slane %v1860_v3, 1  ;;  %v2049_v23 = vperm.slane %v6228_v49, 2 }
 0x22d   : > { %v1917_v54 = vadd.f32 %v1916_v46, %v1915_v42  ;;  %v1923_v55 = vadd.f32 %v1922_v48, %v1921_v44  ;;  %v1931_v13 = vadd.f32 %v1930_v12, %v1892_v59  ;;  %vm1974_vm6 = vweird.f32 %v6217_v37 }
 0x22e   : > { %v1961_v57 = vmul.f32 0.5, %v1960_v50  ;;  %v1926_v31 = vrot.slane %v1925_v58, 2  ;;  %v1862_v34 = vadd.f32 %v1861_v21, %v1860_v3  ;;  %vm1984_vm8 = vweird.f32 %v6219_v38 }
 0x22f   : > { %v1945_v60 = vmul.f32 %v1917_v54, %v6169_v56  ;;  %v1946_v62 = vmul.f32 %v1923_v55, %v6169_v56  ;;  %v1932_v33 = vrot.slane %v1931_v13, 2  ;;  %v2073_v50 = vperm.slane %v6238_v0, 1 }
 0x230   : > { %v5056_v63 = vpop.eup %5055  ;;  %v1962_v1 = vsub.f32 1.5, %v1961_v57  ;;  %v1927_v15 = vadd.f32 %v1926_v31, %v1925_v58  ;;  %v2074_v57 = vperm.slane %v6238_v0, 2 }
 0x231   : > { %v5058_v4 = vpop.eup %5057  ;;  %v1969_v47 = vmul.f32 %v5056_v63, %v6217_v37  ;;  %v6241_v10 = vadd.f32 1e-05, %v1945_v60  ;;  %v6243_v11 = vadd.f32 1e-05, %v1946_v62  ;;  %vm1975_vm5 = vweird.f32 %v5056_v63 }
 0x232   : > { %v1963_v14 = vmul.f32 %v5054_v41, %v1962_v1  ;;  %v1979_v28 = vmul.f32 %v5058_v4, %v6219_v38  ;;  %v1928_v18 = vrot.slane %v1927_v15, 1  ;;  %vm1985_vm7 = vweird.f32 %v5058_v4  ;;  %vm1976_vm9 = vmor %vm1974_vm6, %vm1975_vm5 }
 0x233   : > { %v1970_v8 = vmul.f32 %v5056_v63, %v1969_v47  ;;  %5059 = vrsqrt.f32 %v6241_v10  ;;  %v1877_v37 = vmul.f32 %v6169_v56, %v1862_v34  ;;  %vm1986_vm10 = vmor %vm1984_vm8, %vm1985_vm7  ;;  %v2050_v1 = vperm.slane %v6228_v49, 3 }
 0x234   : > { %v1967_v9 = vsel %vm1966_vm4, %v5054_v41, %v1963_v14  ;;  %v1980_v2 = vmul.f32 %v5058_v4, %v1979_v28  ;;  %5061 = vrsqrt.f32 %v6243_v11  ;;  %v1929_v24 = vadd.f32 %v1928_v18, %v1927_v15 }
 0x235   : > { %v2038_v19 = vmul.f32 %v1967_v9, %v6174_v7  ;;  %v1971_v20 = vmul.f32 0.5, %v1970_v8  ;;  %v1933_v41 = vadd.f32 %v1932_v33, %v1931_v13  ;;  %v6269_v62 = vsub.f32 %v6208_v61, %v1877_v37 }
 0x236   : > { %v1981_v22 = vmul.f32 0.5, %v1980_v2  ;;  %v1947_v36 = vmul.f32 %v1929_v24, %v6169_v56  ;;  %vm1994_vm13 = vweird.f32 %v6241_v10  ;;  %vm2004_vm15 = vweird.f32 %v6243_v11 }
 0x237   : > { %v2063_v25 = vmul.f32 %v2047_v43, %v2038_v19  ;;  %v1972_v26 = vsub.f32 1.5, %v1971_v20  ;;  %v1934_v59 = vrot.slane %v1933_v41, 1  ;;  %v2051_v18 = vperm.slane %v6228_v49, 4 }
 0x238   : > { %v1982_v35 = vsub.f32 1.5, %v1981_v22  ;;  %v6258_v30 = vadd.f32 1e-05, %v1947_v36 }
 0x239   : > { %v5060_v39 = vpop.eup %5059  ;;  %v2088_v7 = vadd.f32 %v2072_v16, %v2063_v25  ;;  %v1973_v40 = vmul.f32 %v5056_v63, %v1972_v26  ;;  %v1935_v31 = vadd.f32 %v1934_v59, %v1933_v41 }
 0x23a   : > { %v5062_v42 = vpop.eup %5061  ;;  %v1983_v44 = vmul.f32 %v5058_v4, %v1982_v35  ;;  %v1989_v45 = vmul.f32 %v5060_v39, %v6241_v10  ;;  %5063 = vrsqrt.f32 %v6258_v30  ;;  %vm1995_vm11 = vweird.f32 %v5060_v39 }
 0x23b   : > { %v2096_v46 = vmax.f32 %v2088_v7, 0.0  ;;  %v1977_v48 = vsel %vm1976_vm9, %v5056_v63, %v1973_v40  ;;  %v1999_v51 = vmul.f32 %v5062_v42, %v6243_v11  ;;  %vm2005_vm12 = vweird.f32 %v5062_v42  ;;  %vm1996_vm14 = vmor %vm1994_vm13, %vm1995_vm11 }
 0x23c   : > { %v2039_v38 = vmul.f32 %v1977_v48, %v6182_v27  ;;  %v1987_v53 = vsel %vm1986_vm10, %v5058_v4, %v1983_v44  ;;  %v1990_v54 = vmul.f32 %v5060_v39, %v1989_v45  ;;  %v1948_v14 = vmul.f32 %v1935_v31, %v6169_v56  ;;  %vm2006_vm0 = vmor %vm2004_vm15, %vm2005_vm12 }
 0x23d   : > { %2104 = vst [vmem:[#allocation2 + $0x30] sm:$0xff] %v2096_v46  ;;  %v2040_v55 = vmul.f32 %v1987_v53, %v6184_v29  ;;  %v2000_v58 = vmul.f32 %v5062_v42, %v1999_v51  ;;  %v1893_v29 = vmul.f32 %v6269_v62, %v6269_v62  ;;  %v2075_v10 = vperm.slane %v6238_v0, 3 }
 0x23e   : > { %v2064_v43 = vmul.f32 %v2048_v17, %v2039_v38  ;;  %v1991_v60 = vmul.f32 0.5, %v1990_v54  ;;  %v1956_v19 = vadd.f32 1e-05, %v1948_v14  ;;  %v2076_v11 = vperm.slane %v6238_v0, 4 }
 0x23f   : > { %v2065_v63 = vmul.f32 %v2049_v23, %v2040_v55  ;;  %v2001_v27 = vmul.f32 0.5, %v2000_v58  ;;  %v1936_v16 = vrot.slane %v1893_v29, 4  ;;  %vm2014_vm2 = vweird.f32 %v6258_v30 }
 0x240   : > { %v2089_v3 = vadd.f32 %v2073_v50, %v2064_v43  ;;  %v1992_v4 = vsub.f32 1.5, %v1991_v60  ;;  %v5064_v28 = vpop.eup %5063  ;;  %5065 = vrsqrt.f32 %v1956_v19  ;;  %v5610_v45 = vmov 0.0  }
 0x241   : > { %v2090_v47 = vadd.f32 %v2074_v57, %v2065_v63  ;;  %v2002_v12 = vsub.f32 1.5, %v2001_v27  ;;  %v2009_v9 = vmul.f32 %v5064_v28, %v6258_v30  ;;  %v1937_v20 = vadd.f32 %v1936_v16, %v1893_v29  ;;  %2112 = vst [vmem:[#allocation25] sm:$0xff] %v5610_v45 }
 0x242   : > { %v2097_v15 = vmax.f32 %v2089_v3, 0.0  ;;  %v1993_v61 = vmul.f32 %v5060_v39, %v1992_v4  ;;  %vm2015_vm1 = vweird.f32 %v5064_v28  ;;  %v2077_v50 = vperm.slane %v6238_v0, 5 }
 0x243   : > { %v2098_v8 = vmax.f32 %v2090_v47, 0.0  ;;  %v2003_v17 = vmul.f32 %v5062_v42, %v2002_v12  ;;  %v2010_v22 = vmul.f32 %v5064_v28, %v2009_v9  ;;  %v1938_v24 = vrot.slane %v1937_v20, 2  ;;  %vm2016_vm3 = vmor %vm2014_vm2, %vm2015_vm1 }
 0x244   : > { %2105 = vst [vmem:[#allocation2] sm:$0xff] %v2097_v15  ;;  %v1997_v2 = vsel %vm1996_vm14, %v5060_v39, %v1993_v61  ;;  %vm2024_vm5 = vweird.f32 %v1956_v19  ;;  %v2053_v43 = vperm.slane %v6228_v49, 6  ;;  %v2054_v14 = vperm.slane %v6228_v49, 7 }
 0x245   : > { %2106 = vst [vmem:[#allocation2 + $0x18] sm:$0xff] %v2098_v8  ;;  %v2041_v13 = vmul.f32 %v1997_v2, %v6198_v5  ;;  %v2007_v21 = vsel %vm2006_vm0, %v5062_v42, %v2003_v17  ;;  %v2011_v26 = vmul.f32 0.5, %v2010_v22  ;;  %v1939_v34 = vadd.f32 %v1938_v24, %v1937_v20 }
 0x246   : > { %v2042_v23 = vmul.f32 %v2007_v21, %v6200_v6  ;;  %v5066_v41 = vpop.eup %5065  ;;  %v2052_v6 = vperm.slane %v6228_v49, 5 }
 0x247   : > { %v2066_v25 = vmul.f32 %v2050_v1, %v2041_v13  ;;  %v2012_v36 = vsub.f32 1.5, %v2011_v26  ;;  %v1940_v7 = vrot.slane %v1939_v34, 1  ;;  %v2019_v46 = vmul.f32 %v5066_v41, %v1956_v19 }
 0x248   : > { %v2067_v33 = vmul.f32 %v2051_v18, %v2042_v23  ;;  %vm2025_vm4 = vweird.f32 %v5066_v41 }
 0x249   : > { %v2091_v35 = vadd.f32 %v2075_v10, %v2066_v25  ;;  %v2013_v40 = vmul.f32 %v5064_v28, %v2012_v36  ;;  %v1941_v44 = vadd.f32 %v1940_v7, %v1939_v34  ;;  %v2020_v38 = vmul.f32 %v5066_v41, %v2019_v46  ;;  %vm2026_vm6 = vmor %vm2024_vm5, %vm2025_vm4 }
 0x24a   : > { %v2092_v39 = vadd.f32 %v2076_v11, %v2067_v33 }
 0x24b   : > { %v2099_v5 = vmax.f32 %v2091_v35, 0.0  ;;  %v2017_v37 = vsel %vm2016_vm3, %v5064_v28, %v2013_v40  ;;  %v1949_v51 = vmul.f32 %v1941_v44, %v6169_v56  ;;  %v2021_v54 = vmul.f32 0.5, %v2020_v38 }
 0x24c   : > { %v2100_v42 = vmax.f32 %v2092_v39, 0.0  ;;  %v2043_v48 = vmul.f32 %v2017_v37, %v6215_v32  ;;  %v2078_v56 = vperm.slane %v6238_v0, 6 }
 0x24d   : > { %2107 = vst [vmem:[#allocation2 + $0x10] sm:$0xff] %v2099_v5  ;;  %v1957_v53 = vadd.f32 1e-05, %v1949_v51  ;;  %v2022_v57 = vsub.f32 1.5, %v2021_v54 }
 0x24e   : > { %2108 = vst [vmem:[#allocation2 + $0x8] sm:$0xff] %v2100_v42  ;;  %v2068_v30 = vmul.f32 %v2052_v6, %v2043_v48 }
 0x24f   : > { %5067 = vrsqrt.f32 %v1957_v53  ;;  %v2023_v59 = vmul.f32 %v5066_v41, %v2022_v57  ;;  %vm2034_vm8 = vweird.f32 %v1957_v53 }
 0x250   : > { %v2093_v55 = vadd.f32 %v2077_v50, %v2068_v30 }
 0x251   : > { %v2027_v32 = vsel %vm2026_vm6, %v5066_v41, %v2023_v59 }
 0x252   : > { %v2101_v58 = vmax.f32 %v2093_v55, 0.0  ;;  %v2044_v63 = vmul.f32 %v2027_v32, %v6231_v52  ;;  %v2079_v52 = vperm.slane %v6238_v0, 7 }
 0x254   : > { %2109 = vst [vmem:[#allocation2 + $0x20] sm:$0xff] %v2101_v58  ;;  %v2069_v27 = vmul.f32 %v2053_v43, %v2044_v63 }
 0x255   : > { %v5068_v60 = vpop.eup %5067 }
 0x256   : > { %v2029_v1 = vmul.f32 %v5068_v60, %v1957_v53  ;;  %v2094_v3 = vadd.f32 %v2078_v56, %v2069_v27  ;;  %vm2035_vm7 = vweird.f32 %v5068_v60 }
 0x257   : > { %vm2036_vm9 = vmor %vm2034_vm8, %vm2035_vm7 }
 0x258   : > { %v2030_v31 = vmul.f32 %v5068_v60, %v2029_v1  ;;  %v2102_v29 = vmax.f32 %v2094_v3, 0.0 }
 0x25a   : > { %v2031_v4 = vmul.f32 0.5, %v2030_v31  ;;  %2110 = vst [vmem:[#allocation2 + $0x28] sm:$0xff] %v2102_v29 }
 0x25c   : > { %v2032_v47 = vsub.f32 1.5, %v2031_v4 }
 0x25e   : > { %v2033_v12 = vmul.f32 %v5068_v60, %v2032_v47 }
 0x260   : > { %v2037_v28 = vsel %vm2036_vm9, %v5068_v60, %v2033_v12 }
 0x261   : > { %v2045_v15 = vmul.f32 %v2037_v28, %v6269_v62 }
 0x263   : > { %v2070_v61 = vmul.f32 %v2054_v14, %v2045_v15 }
 0x265   : > { %v2095_v16 = vadd.f32 %v2079_v52, %v2070_v61 }
 0x267   : > { %v2103_v8 = vmax.f32 %v2095_v16, 0.0 }
 0x269   : > { %2111 = vst [vmem:[#allocation2 + $0x38] sm:$0xff] %v2103_v8 }
 0x26a PF: > { %v4114_v49 = vld [vmem:[%s5924_s17 + $0x70] sm:$0xf]  ;;  %v4756_v62 = vld [vmem:[%s5924_s17 + $0x74] sm:$0xf0]  ;;  %v4106_v21 = vld [vmem:[%s5924_s17 + $0x60] sm:$0xf] }
 0x26b   : > { %v4178_v0 = vld [vmem:[%s5924_s17 + $0xf0] sm:$0xf]  ;;  %v4115_v17 = vor.u32 %v4756_v62, %v4114_v49  ;;  %v4772_v9 = vld [vmem:[%s5924_s17 + $0xf4] sm:$0xf0]  ;;  %v4754_v23 = vld [vmem:[%s5924_s17 + $0x64] sm:$0xf0] }
 0x26c   : > { %v4242_v2 = vld [vmem:[%s5924_s17 + $0x170] sm:$0xf]  ;;  %v4788_v18 = vld [vmem:[%s5924_s17 + $0x174] sm:$0xf0]  ;;  %v4179_v19 = vor.u32 %v4772_v9, %v4178_v0  ;;  %v4170_v11 = vld [vmem:[%s5924_s17 + $0xe0] sm:$0xf]  ;;  %v4107_v25 = vor.u32 %v4754_v23, %v4106_v21 }
 0x26d   : > { %v4243_v20 = vor.u32 %v4788_v18, %v4242_v2  ;;  %v4306_v13 = vld [vmem:[%s5924_s17 + $0x1f0] sm:$0xf]  ;;  %v4804_v10 = vld [vmem:[%s5924_s17 + $0x1f4] sm:$0xf0]  ;;  %2903 = vmatpush.bf16.msra.mxu0 %v4115_v17  ;;  %v4770_v24 = vld [vmem:[%s5924_s17 + $0xe4] sm:$0xf0] }
 0x26e   : > { %v4307_v22 = vor.u32 %v4804_v10, %v4306_v13  ;;  %2916 = vmatpush.bf16.msra.mxu1 %v4179_v19  ;;  %v4171_v26 = vor.u32 %v4770_v24, %v4170_v11  ;;  %v4234_v33 = vld [vmem:[%s5924_s17 + $0x160] sm:$0xf]  ;;  %v4786_v34 = vld [vmem:[%s5924_s17 + $0x164] sm:$0xf0]  ;;  %v4098_v7 = vld [vmem:[%s5924_s17 + $0x50] sm:$0xf] }
 0x26f   : > { %2929 = vmatpush.bf16.msra.mxu2 %v4243_v20  ;;  %v4298_v35 = vld [vmem:[%s5924_s17 + $0x1e0] sm:$0xf]  ;;  %v4235_v36 = vor.u32 %v4786_v34, %v4234_v33  ;;  %v4802_v39 = vld [vmem:[%s5924_s17 + $0x1e4] sm:$0xf0]  ;;  %v4752_v5 = vld [vmem:[%s5924_s17 + $0x54] sm:$0xf0] }
 0x270   : > { %2942 = vmatpush.bf16.msra.mxu3 %v4307_v22  ;;  %v4299_v40 = vor.u32 %v4802_v39, %v4298_v35  ;;  %v4162_v41 = vld [vmem:[%s5924_s17 + $0xd0] sm:$0xf]  ;;  %v4768_v42 = vld [vmem:[%s5924_s17 + $0xd4] sm:$0xf0]  ;;  %v4099_v44 = vor.u32 %v4752_v5, %v4098_v7  ;;  %v4090_v51 = vld [vmem:[%s5924_s17 + $0x40] sm:$0xf] }
 0x271   : > { %v4226_v6 = vld [vmem:[%s5924_s17 + $0x150] sm:$0xf]  ;;  %2904 = vmatpush.bf16.msra.mxu0 %v4107_v25  ;;  %v4784_v45 = vld [vmem:[%s5924_s17 + $0x154] sm:$0xf0]  ;;  %v4163_v48 = vor.u32 %v4768_v42, %v4162_v41  ;;  %v4750_v38 = vld [vmem:[%s5924_s17 + $0x44] sm:$0xf0] }
 0x272   : > { %v4290_v37 = vld [vmem:[%s5924_s17 + $0x1d0] sm:$0xf]  ;;  %v4800_v46 = vld [vmem:[%s5924_s17 + $0x1d4] sm:$0xf0]  ;;  %2917 = vmatpush.bf16.msra.mxu1 %v4171_v26  ;;  %v4227_v50 = vor.u32 %v4784_v45, %v4226_v6  ;;  %v4154_v30 = vld [vmem:[%s5924_s17 + $0xc0] sm:$0xf]  ;;  %v4091_v43 = vor.u32 %v4750_v38, %v4090_v51 }
 0x273   : > { %2930 = vmatpush.bf16.msra.mxu2 %v4235_v36  ;;  %v4291_v53 = vor.u32 %v4800_v46, %v4290_v37  ;;  %v4766_v54 = vld [vmem:[%s5924_s17 + $0xc4] sm:$0xf0]  ;;  %v4218_v55 = vld [vmem:[%s5924_s17 + $0x140] sm:$0xf]  ;;  %v4082_v63 = vld [vmem:[%s5924_s17 + $0x30] sm:$0xf] }
 0x274   : > { %2943 = vmatpush.bf16.msra.mxu3 %v4299_v40  ;;  %v4782_v57 = vld [vmem:[%s5924_s17 + $0x144] sm:$0xf0]  ;;  %v4282_v58 = vld [vmem:[%s5924_s17 + $0x1c0] sm:$0xf]  ;;  %v4155_v32 = vor.u32 %v4766_v54, %v4154_v30  ;;  %v4748_v56 = vld [vmem:[%s5924_s17 + $0x34] sm:$0xf0] }
 0x275   : > { %v4798_v59 = vld [vmem:[%s5924_s17 + $0x1c4] sm:$0xf0]  ;;  %2905 = vmatpush.bf16.msra.mxu0 %v4099_v44  ;;  %v4219_v60 = vor.u32 %v4782_v57, %v4218_v55  ;;  %v4146_v1 = vld [vmem:[%s5924_s17 + $0xb0] sm:$0xf]  ;;  %v4764_v31 = vld [vmem:[%s5924_s17 + $0xb4] sm:$0xf0]  ;;  %v4083_v12 = vor.u32 %v4748_v56, %v4082_v63 }
 0x276   : > { %2918 = vmatpush.bf16.msra.mxu1 %v4163_v48  ;;  %v4283_v27 = vor.u32 %v4798_v59, %v4282_v58  ;;  %v4210_v3 = vld [vmem:[%s5924_s17 + $0x130] sm:$0xf]  ;;  %v4780_v4 = vld [vmem:[%s5924_s17 + $0x134] sm:$0xf0]  ;;  %v4147_v14 = vor.u32 %v4764_v31, %v4146_v1  ;;  %v4074_v15 = vld [vmem:[%s5924_s17 + $0x20] sm:$0xf] }
 0x277   : > { %2931 = vmatpush.bf16.msra.mxu2 %v4227_v50  ;;  %v4274_v29 = vld [vmem:[%s5924_s17 + $0x1b0] sm:$0xf]  ;;  %v4796_v47 = vld [vmem:[%s5924_s17 + $0x1b4] sm:$0xf0]  ;;  %v4211_v28 = vor.u32 %v4780_v4, %v4210_v3  ;;  %v4746_v52 = vld [vmem:[%s5924_s17 + $0x24] sm:$0xf0] }
 0x278   : > { %2944 = vmatpush.bf16.msra.mxu3 %v4291_v53  ;;  %v4138_v61 = vld [vmem:[%s5924_s17 + $0xa0] sm:$0xf]  ;;  %v4275_v16 = vor.u32 %v4796_v47, %v4274_v29  ;;  %v4762_v8 = vld [vmem:[%s5924_s17 + $0xa4] sm:$0xf0]  ;;  %v4075_v9 = vor.u32 %v4746_v52, %v4074_v15  ;;  %v4066_v19 = vld [vmem:[%s5924_s17 + $0x10] sm:$0xf] }
 0x279   : > { %2906 = vmatpush.bf16.msra.mxu0 %v4091_v43  ;;  %v4202_v49 = vld [vmem:[%s5924_s17 + $0x120] sm:$0xf]  ;;  %v4778_v62 = vld [vmem:[%s5924_s17 + $0x124] sm:$0xf0]  ;;  %v4139_v2 = vor.u32 %v4762_v8, %v4138_v61  ;;  %v4744_v20 = vld [vmem:[%s5924_s17 + $0x14] sm:$0xf0] }
 0x27a   : > { %2919 = vmatpush.bf16.msra.mxu1 %v4155_v32  ;;  %v4266_v0 = vld [vmem:[%s5924_s17 + $0x1a0] sm:$0xf]  ;;  %v4794_v17 = vld [vmem:[%s5924_s17 + $0x1a4] sm:$0xf0]  ;;  %v4203_v18 = vor.u32 %v4778_v62, %v4202_v49  ;;  %v4130_v13 = vld [vmem:[%s5924_s17 + $0x90] sm:$0xf]  ;;  %v4067_v25 = vor.u32 %v4744_v20, %v4066_v19 }
 0x27b   : > { %2932 = vmatpush.bf16.msra.mxu2 %v4219_v60  ;;  %v4267_v10 = vor.u32 %v4794_v17, %v4266_v0  ;;  %v4760_v21 = vld [vmem:[%s5924_s17 + $0x94] sm:$0xf0]  ;;  %v4194_v22 = vld [vmem:[%s5924_s17 + $0x110] sm:$0xf]  ;;  %v4058_v26 = vld [vmem:[%s5924_s17] sm:$0xf] }
 0x27c   : > { %2945 = vmatpush.bf16.msra.mxu3 %v4283_v27  ;;  %v4776_v23 = vld [vmem:[%s5924_s17 + $0x114] sm:$0xf0]  ;;  %v4258_v11 = vld [vmem:[%s5924_s17 + $0x190] sm:$0xf]  ;;  %v4742_v33 = vld [vmem:[%s5924_s17 + $0x4] sm:$0xf0]  ;;  %v4131_v34 = vor.u32 %v4760_v21, %v4130_v13 }
 0x27d   : > { %2907 = vmatpush.bf16.msra.mxu0 %v4083_v12  ;;  %v4792_v24 = vld [vmem:[%s5924_s17 + $0x194] sm:$0xf0]  ;;  %v4195_v35 = vor.u32 %v4776_v23, %v4194_v22  ;;  %v4122_v36 = vld [vmem:[%s5924_s17 + $0x80] sm:$0xf]  ;;  %v4758_v39 = vld [vmem:[%s5924_s17 + $0x84] sm:$0xf0]  ;;  %v4059_v37 = vor.u32 %v4742_v33, %v4058_v26 }
 0x27e   : > { %2920 = vmatpush.bf16.msra.mxu1 %v4147_v14  ;;  %v4186_v7 = vld [vmem:[%s5924_s17 + $0x100] sm:$0xf]  ;;  %v4259_v5 = vor.u32 %v4792_v24, %v4258_v11  ;;  %v4774_v40 = vld [vmem:[%s5924_s17 + $0x104] sm:$0xf0]  ;;  %v4370_v6 = vld [vmem:[%s5924_s17 + $0x270] sm:$0xf]  ;;  %v4123_v51 = vor.u32 %v4758_v39, %v4122_v36 }
 0x27f   : > { %2933 = vmatpush.bf16.msra.mxu2 %v4211_v28  ;;  %v4250_v41 = vld [vmem:[%s5924_s17 + $0x180] sm:$0xf]  ;;  %v4790_v42 = vld [vmem:[%s5924_s17 + $0x184] sm:$0xf0]  ;;  %v4820_v44 = vld [vmem:[%s5924_s17 + $0x274] sm:$0xf0]  ;;  %v4187_v38 = vor.u32 %v4774_v40, %v4186_v7 }
 0x280   : > { %2946 = vmatpush.bf16.msra.mxu3 %v4275_v16  ;;  %v4434_v45 = vld [vmem:[%s5924_s17 + $0x2f0] sm:$0xf]  ;;  %v4836_v46 = vld [vmem:[%s5924_s17 + $0x2f4] sm:$0xf0]  ;;  %v4251_v54 = vor.u32 %v4790_v42, %v4250_v41  ;;  %v4371_v55 = vor.u32 %v4820_v44, %v4370_v6  ;;  %v4362_v59 = vld [vmem:[%s5924_s17 + $0x260] sm:$0xf] }
 0x281   : > { %2908 = vmatpush.bf16.msra.mxu0 %v4075_v9  ;;  %v4498_v48 = vld [vmem:[%s5924_s17 + $0x370] sm:$0xf]  ;;  %v4852_v50 = vld [vmem:[%s5924_s17 + $0x374] sm:$0xf0]  ;;  %v4435_v57 = vor.u32 %v4836_v46, %v4434_v45  ;;  %v4818_v43 = vld [vmem:[%s5924_s17 + $0x264] sm:$0xf0] }
 0x282   : > { %2921 = vmatpush.bf16.msra.mxu1 %v4139_v2  ;;  %v4562_v30 = vld [vmem:[%s5924_s17 + $0x3f0] sm:$0xf]  ;;  %v4868_v53 = vld [vmem:[%s5924_s17 + $0x3f4] sm:$0xf0]  ;;  %v4499_v58 = vor.u32 %v4852_v50, %v4498_v48  ;;  %v4426_v32 = vld [vmem:[%s5924_s17 + $0x2e0] sm:$0xf]  ;;  %v4363_v4 = vor.u32 %v4818_v43, %v4362_v59 }
 0x283   : > { %2934 = vmatpush.bf16.msra.mxu2 %v4203_v18  ;;  %v4563_v60 = vor.u32 %v4868_v53, %v4562_v30  ;;  %v4834_v63 = vld [vmem:[%s5924_s17 + $0x2e4] sm:$0xf0]  ;;  %v4490_v56 = vld [vmem:[%s5924_s17 + $0x360] sm:$0xf]  ;;  %v4354_v29 = vld [vmem:[%s5924_s17 + $0x250] sm:$0xf] }
 0x284   : > { %2947 = vmatpush.bf16.msra.mxu3 %v4267_v10  ;;  %v4850_v1 = vld [vmem:[%s5924_s17 + $0x364] sm:$0xf0]  ;;  %v4554_v27 = vld [vmem:[%s5924_s17 + $0x3e0] sm:$0xf]  ;;  %v4816_v47 = vld [vmem:[%s5924_s17 + $0x254] sm:$0xf0]  ;;  %v4427_v28 = vor.u32 %v4834_v63, %v4426_v32 }
 0x285   : > { %2909 = vmatpush.bf16.msra.mxu0 %v4067_v25  ;;  %v4866_v31 = vld [vmem:[%s5924_s17 + $0x3e4] sm:$0xf0]  ;;  %v2115_v3 = vld [vmem:[#allocation2 + $0x18] sm:$0xff]  ;;  %v4418_v12 = vld [vmem:[%s5924_s17 + $0x2d0] sm:$0xf]  ;;  %v4491_v15 = vor.u32 %v4850_v1, %v4490_v56  ;;  %v4355_v20 = vor.u32 %v4816_v47, %v4354_v29 }
 0x286   : > { %2922 = vmatpush.bf16.msra.mxu1 %v4131_v34  ;;  %v6377_v14 = vpack.c.bf16 %v2115_v3, %v2115_v3  ;;  %v4832_v52 = vld [vmem:[%s5924_s17 + $0x2d4] sm:$0xf0]  ;;  %v4482_v61 = vld [vmem:[%s5924_s17 + $0x350] sm:$0xf]  ;;  %v4555_v8 = vor.u32 %v4866_v31, %v4554_v27  ;;  %v2114_v0 = vld [vmem:[#allocation2] sm:$0xff] }
 0x287   : > { %2935 = vmatpush.bf16.msra.mxu2 %v4195_v35  ;;  %v4848_v16 = vld [vmem:[%s5924_s17 + $0x354] sm:$0xf0]  ;;  %v4546_v17 = vld [vmem:[%s5924_s17 + $0x3d0] sm:$0xf]  ;;  %v6389_v19 = vpack.c.bf16 %v2114_v0, %v2114_v0  ;;  %v4419_v13 = vor.u32 %v4832_v52, %v4418_v12  ;;  %v4346_v21 = vld [vmem:[%s5924_s17 + $0x240] sm:$0xf] }
 0x288   : > { %2948 = vmatpush.bf16.msra.mxu3 %v4259_v5  ;;  %v2113_v49 = vld [vmem:[#allocation2 + $0x30] sm:$0xff]  ;;  %v4483_v10 = vor.u32 %v4848_v16, %v4482_v61  ;;  %v4814_v22 = vld [vmem:[%s5924_s17 + $0x244] sm:$0xf0]  ;;  %v4410_v23 = vld [vmem:[%s5924_s17 + $0x2c0] sm:$0xf] }
 0x289   : > { %2910 = vmatpush.bf16.msra.mxu0 %v4059_v37  ;;  %v2116_v62 = vld [vmem:[#allocation2 + $0x10] sm:$0xff]  ;;  %v6385_v2 = vpack.c.bf16 %v2113_v49, %v2113_v49  ;;  %v4830_v24 = vld [vmem:[%s5924_s17 + $0x2c4] sm:$0xf0]  ;;  %v4474_v25 = vld [vmem:[%s5924_s17 + $0x340] sm:$0xf]  ;;  %v4347_v35 = vor.u32 %v4814_v22, %v4346_v21 }
 0x28a   : > { %2923 = vmatpush.bf16.msra.mxu1 %v4123_v51  ;;  %v4864_v9 = vld [vmem:[%s5924_s17 + $0x3d4] sm:$0xf0]  ;;  %v6387_v18 = vpack.c.bf16 %v2116_v62, %v2116_v62  ;;  %v4846_v26 = vld [vmem:[%s5924_s17 + $0x344] sm:$0xf0]  ;;  %v4538_v33 = vld [vmem:[%s5924_s17 + $0x3c0] sm:$0xf]  ;;  %v4411_v36 = vor.u32 %v4830_v24, %v4410_v23 }
 0x28b   : > { %2936 = vmatpush.bf16.msra.mxu2 %v4187_v38  ;;  %v4547_v11 = vor.u32 %v4864_v9, %v4546_v17  ;;  %v4862_v34 = vld [vmem:[%s5924_s17 + $0x3c4] sm:$0xf0]  ;;  %v4475_v39 = vor.u32 %v4846_v26, %v4474_v25  ;;  %v4338_v7 = vld [vmem:[%s5924_s17 + $0x230] sm:$0xf]  ;;  %v4812_v5 = vld [vmem:[%s5924_s17 + $0x234] sm:$0xf0] }
 0x28c   : > { %2949 = vmatpush.bf16.msra.mxu3 %v4251_v54  ;;  %2911 = vmatmul.bf16.vlgmr.msra.gmra.mxu0 %v6385_v2  ;;  %v4402_v40 = vld [vmem:[%s5924_s17 + $0x2b0] sm:$0xf]  ;;  %v4539_v41 = vor.u32 %v4862_v34, %v4538_v33  ;;  %v4828_v42 = vld [vmem:[%s5924_s17 + $0x2b4] sm:$0xf0]  ;;  %v4339_v46 = vor.u32 %v4812_v5, %v4338_v7  ;;  %v4330_v51 = vld [vmem:[%s5924_s17 + $0x220] sm:$0xf] }
 0x28d   : > { %2955 = vmatpush.bf16.msrb.mxu0 %v4371_v55  ;;  %2924 = vmatmul.bf16.vlgmr.msra.gmra.mxu1 %v6389_v19  ;;  %v4466_v6 = vld [vmem:[%s5924_s17 + $0x330] sm:$0xf]  ;;  %v4844_v44 = vld [vmem:[%s5924_s17 + $0x334] sm:$0xf0]  ;;  %v4403_v48 = vor.u32 %v4828_v42, %v4402_v40  ;;  %v4810_v38 = vld [vmem:[%s5924_s17 + $0x224] sm:$0xf0] }
 0x28e   : > { %2968 = vmatpush.bf16.msrb.mxu1 %v4435_v57  ;;  %2937 = vmatmul.bf16.vlgmr.msra.gmra.mxu2 %v6377_v14  ;;  %v4530_v45 = vld [vmem:[%s5924_s17 + $0x3b0] sm:$0xf]  ;;  %v4860_v37 = vld [vmem:[%s5924_s17 + $0x3b4] sm:$0xf0]  ;;  %v4467_v50 = vor.u32 %v4844_v44, %v4466_v6  ;;  %v4394_v30 = vld [vmem:[%s5924_s17 + $0x2a0] sm:$0xf]  ;;  %v4331_v43 = vor.u32 %v4810_v38, %v4330_v51 }
 0x28f   : > { %2981 = vmatpush.bf16.msrb.mxu2 %v4499_v58  ;;  %2950 = vmatmul.bf16.vlgmr.msra.gmra.mxu3 %v6387_v18  ;;  %v4531_v53 = vor.u32 %v4860_v37, %v4530_v45  ;;  %v4826_v54 = vld [vmem:[%s5924_s17 + $0x2a4] sm:$0xf0]  ;;  %v4458_v55 = vld [vmem:[%s5924_s17 + $0x320] sm:$0xf]  ;;  %v4322_v63 = vld [vmem:[%s5924_s17 + $0x210] sm:$0xf] }
 0x290   : > { %2994 = vmatpush.bf16.msrb.mxu3 %v4563_v60  ;;  %v4842_v57 = vld [vmem:[%s5924_s17 + $0x324] sm:$0xf0]  ;;  %v4522_v58 = vld [vmem:[%s5924_s17 + $0x3a0] sm:$0xf]  ;;  %v4395_v32 = vor.u32 %v4826_v54, %v4394_v30  ;;  %v4808_v56 = vld [vmem:[%s5924_s17 + $0x214] sm:$0xf0] }
 0x291   : > { %2956 = vmatpush.bf16.msrb.mxu0 %v4363_v4  ;;  %v4858_v59 = vld [vmem:[%s5924_s17 + $0x3a4] sm:$0xf0]  ;;  %v4459_v60 = vor.u32 %v4842_v57, %v4458_v55  ;;  %v4386_v1 = vld [vmem:[%s5924_s17 + $0x290] sm:$0xf]  ;;  %v4824_v31 = vld [vmem:[%s5924_s17 + $0x294] sm:$0xf0]  ;;  %v4323_v12 = vor.u32 %v4808_v56, %v4322_v63 }
 0x292   : > { %2969 = vmatpush.bf16.msrb.mxu1 %v4427_v28  ;;  %v4523_v27 = vor.u32 %v4858_v59, %v4522_v58  ;;  %v4450_v3 = vld [vmem:[%s5924_s17 + $0x310] sm:$0xf]  ;;  %v4840_v4 = vld [vmem:[%s5924_s17 + $0x314] sm:$0xf0]  ;;  %v4314_v28 = vld [vmem:[%s5924_s17 + $0x200] sm:$0xf]  ;;  %v4387_v52 = vor.u32 %v4824_v31, %v4386_v1 }
 0x293   : > { %2982 = vmatpush.bf16.msrb.mxu2 %v4491_v15  ;;  %v4514_v29 = vld [vmem:[%s5924_s17 + $0x390] sm:$0xf]  ;;  %v4856_v47 = vld [vmem:[%s5924_s17 + $0x394] sm:$0xf0]  ;;  %v4806_v15 = vld [vmem:[%s5924_s17 + $0x204] sm:$0xf0]  ;;  %v4451_v61 = vor.u32 %v4840_v4, %v4450_v3 }
 0x294   : > { %2995 = vmatpush.bf16.msrb.mxu3 %v4555_v8  ;;  %v4378_v16 = vld [vmem:[%s5924_s17 + $0x280] sm:$0xf]  ;;  %v4822_v8 = vld [vmem:[%s5924_s17 + $0x284] sm:$0xf0]  ;;  %v4515_v62 = vor.u32 %v4856_v47, %v4514_v29  ;;  %v4315_v21 = vor.u32 %v4806_v15, %v4314_v28  ;;  %v4180_v22 = vld [vmem:[%s5924_s17 + $0xf8] sm:$0xf0] }
 0x295   : > { %2957 = vmatpush.bf16.msrb.mxu0 %v4355_v20  ;;  %v4442_v49 = vld [vmem:[%s5924_s17 + $0x300] sm:$0xf]  ;;  %v4838_v0 = vld [vmem:[%s5924_s17 + $0x304] sm:$0xf0]  ;;  %v4755_v20 = vld [vmem:[%s5924_s17 + $0x74] sm:$0xf]  ;;  %v4379_v24 = vor.u32 %v4822_v8, %v4378_v16 }
 0x296   : > { %2970 = vmatpush.bf16.msrb.mxu1 %v4419_v13  ;;  %v4506_v17 = vld [vmem:[%s5924_s17 + $0x380] sm:$0xf]  ;;  %v4854_v9 = vld [vmem:[%s5924_s17 + $0x384] sm:$0xf0]  ;;  %v4116_v13 = vld [vmem:[%s5924_s17 + $0x78] sm:$0xf0]  ;;  %v4443_v25 = vor.u32 %v4838_v0, %v4442_v49 }
 0x297   : > { %2983 = vmatpush.bf16.msrb.mxu2 %v4483_v10  ;;  %v4771_v10 = vld [vmem:[%s5924_s17 + $0xf4] sm:$0xf]  ;;  %v4308_v33 = vld [vmem:[%s5924_s17 + $0x1f8] sm:$0xf0]  ;;  %v2119_v34 = vld [vmem:[#allocation2 + $0x28] sm:$0xff] }
 0x298   : > { %2996 = vmatpush.bf16.msrb.mxu3 %v4547_v11  ;;  %v4787_v23 = vld [vmem:[%s5924_s17 + $0x174] sm:$0xf]  ;;  %v4244_v11 = vld [vmem:[%s5924_s17 + $0x178] sm:$0xf0]  ;;  %v4753_v5 = vld [vmem:[%s5924_s17 + $0x64] sm:$0xf]  ;;  %v4183_v40 = vor.u32 %v4771_v10, %v4180_v22  ;;  %v6445_v37 = vpack.c.bf16 %v2119_v34, %v2119_v34 }
 0x299   : > { %2958 = vmatpush.bf16.msrb.mxu0 %v4347_v35  ;;  %v4803_v26 = vld [vmem:[%s5924_s17 + $0x1f4] sm:$0xf]  ;;  %v4507_v35 = vor.u32 %v4854_v9, %v4506_v17  ;;  %v2120_v7 = vld [vmem:[#allocation2 + $0x38] sm:$0xff]  ;;  %v4108_v42 = vld [vmem:[%s5924_s17 + $0x68] sm:$0xf0] }
 0x29a   : > { %2971 = vmatpush.bf16.msrb.mxu1 %v4411_v36  ;;  %v4119_v36 = vor.u32 %v4755_v20, %v4116_v13  ;;  %v4769_v6 = vld [vmem:[%s5924_s17 + $0xe4] sm:$0xf]  ;;  %v4311_v45 = vor.u32 %v4803_v26, %v4308_v33  ;;  %v6452_v38 = vpack.c.bf16 %v2120_v7, %v2120_v7  ;;  %v4111_v54 = vor.u32 %v4753_v5, %v4108_v42  ;;  %v4751_v59 = vld [vmem:[%s5924_s17 + $0x54] sm:$0xf]  ;;  %v4164_v63 = vld [vmem:[%s5924_s17 + $0xd8] sm:$0xf0] }
 0x29b   : > { %2984 = vmatpush.bf16.msrb.mxu2 %v4475_v39  ;;  %v2117_v39 = vld [vmem:[#allocation2 + $0x8] sm:$0xff]  ;;  %v2118_v44 = vld [vmem:[#allocation2 + $0x20] sm:$0xff]  ;;  %v4783_v56 = vld [vmem:[%s5924_s17 + $0x154] sm:$0xf] }
 0x29c   : > { %2997 = vmatpush.bf16.msrb.mxu3 %v4539_v41  ;;  %v4247_v41 = vor.u32 %v4787_v23, %v4244_v11  ;;  %v6450_v51 = vpack.c.bf16 %v2117_v39, %v2117_v39  ;;  %v4801_v30 = vld [vmem:[%s5924_s17 + $0x1e4] sm:$0xf]  ;;  %v6456_v55 = vpack.c.bf16 %v2118_v44, %v2118_v44  ;;  %v4228_v1 = vld [vmem:[%s5924_s17 + $0x158] sm:$0xf0]  ;;  %v4220_v16 = vld [vmem:[%s5924_s17 + $0x148] sm:$0xf0] }
 0x29d   : > { %2959 = vmatpush.bf16.msrb.mxu0 %v4339_v46  ;;  %v4172_v46 = vld [vmem:[%s5924_s17 + $0xe8] sm:$0xf0]  ;;  %v4292_v31 = vld [vmem:[%s5924_s17 + $0x1d8] sm:$0xf0]  ;;  %v4231_v29 = vor.u32 %v4783_v56, %v4228_v1  ;;  %v4749_v47 = vld [vmem:[%s5924_s17 + $0x44] sm:$0xf] }
 0x29e   : > { %2972 = vmatpush.bf16.msrb.mxu1 %v4403_v48  ;;  %v4785_v48 = vld [vmem:[%s5924_s17 + $0x164] sm:$0xf]  ;;  %v4175_v57 = vor.u32 %v4769_v6, %v4172_v46  ;;  %v4284_v49 = vld [vmem:[%s5924_s17 + $0x1c8] sm:$0xf0]  ;;  %v4747_v9 = vld [vmem:[%s5924_s17 + $0x34] sm:$0xf] }
 0x29f   : > { %2985 = vmatpush.bf16.msrb.mxu2 %v4467_v50  ;;  %v4236_v50 = vld [vmem:[%s5924_s17 + $0x168] sm:$0xf0]  ;;  %v4765_v28 = vld [vmem:[%s5924_s17 + $0xc4] sm:$0xf]  ;;  %v4084_v20 = vld [vmem:[%s5924_s17 + $0x38] sm:$0xf0] }
 0x2a0   : > { %2998 = vmatpush.bf16.msrb.mxu3 %v4531_v53  ;;  %v4300_v53 = vld [vmem:[%s5924_s17 + $0x1e8] sm:$0xf0]  ;;  %v4239_v58 = vor.u32 %v4785_v48, %v4236_v50  ;;  %v4797_v8 = vld [vmem:[%s5924_s17 + $0x1c4] sm:$0xf]  ;;  %v4763_v13 = vld [vmem:[%s5924_s17 + $0xb4] sm:$0xf] }
 0x2a1   : > { %2960 = vmatpush.bf16.msrb.mxu0 %v4331_v43  ;;  %v4100_v43 = vld [vmem:[%s5924_s17 + $0x58] sm:$0xf0]  ;;  %v4287_v10 = vor.u32 %v4797_v8, %v4284_v49  ;;  %v4779_v22 = vld [vmem:[%s5924_s17 + $0x134] sm:$0xf]  ;;  %v4745_v34 = vld [vmem:[%s5924_s17 + $0x24] sm:$0xf] }
 0x2a2   : > { %2973 = vmatpush.bf16.msrb.mxu1 %v4395_v32  ;;  %v4767_v32 = vld [vmem:[%s5924_s17 + $0xd4] sm:$0xf]  ;;  %v4103_v3 = vor.u32 %v4751_v59, %v4100_v43  ;;  %v4212_v23 = vld [vmem:[%s5924_s17 + $0x138] sm:$0xf0]  ;;  %v4140_v7 = vld [vmem:[%s5924_s17 + $0xa8] sm:$0xf0] }
 0x2a3   : > { %2986 = vmatpush.bf16.msrb.mxu2 %v4459_v60  ;;  %v4303_v60 = vor.u32 %v4801_v30, %v4300_v53  ;;  %v4167_v4 = vor.u32 %v4767_v32, %v4164_v63  ;;  %v4795_v11 = vld [vmem:[%s5924_s17 + $0x1b4] sm:$0xf]  ;;  %v4215_v33 = vor.u32 %v4779_v22, %v4212_v23  ;;  %v4777_v5 = vld [vmem:[%s5924_s17 + $0x124] sm:$0xf]  ;;  %v4268_v42 = vld [vmem:[%s5924_s17 + $0x1a8] sm:$0xf0] }
 0x2a4   : > { %2999 = vmatpush.bf16.msrb.mxu3 %v4523_v27  ;;  %v4799_v27 = vld [vmem:[%s5924_s17 + $0x1d4] sm:$0xf]  ;;  %v4068_v48 = vld [vmem:[%s5924_s17 + $0x18] sm:$0xf0]  ;;  %v4741_v32 = vld [vmem:[%s5924_s17 + $0x4] sm:$0xf] }
 0x2a5   : > { %2961 = vmatpush.bf16.msrb.mxu0 %v4323_v12  ;;  %v4092_v12 = vld [vmem:[%s5924_s17 + $0x48] sm:$0xf0]  ;;  %v4295_v15 = vor.u32 %v4799_v27, %v4292_v31  ;;  %v4743_v46 = vld [vmem:[%s5924_s17 + $0x14] sm:$0xf]  ;;  %v4132_v53 = vld [vmem:[%s5924_s17 + $0x98] sm:$0xf0] }
 0x2a6   : > { %2974 = vmatpush.bf16.msrb.mxu1 %v4387_v52  ;;  %v4156_v52 = vld [vmem:[%s5924_s17 + $0xc8] sm:$0xf0]  ;;  %v4759_v50 = vld [vmem:[%s5924_s17 + $0x94] sm:$0xf]  ;;  %v4260_v59 = vld [vmem:[%s5924_s17 + $0x198] sm:$0xf0]  ;;  %v4071_v43 = vor.u32 %v4743_v46, %v4068_v48 }
 0x2a7   : > { %2987 = vmatpush.bf16.msrb.mxu2 %v4451_v61  ;;  %v4781_v61 = vld [vmem:[%s5924_s17 + $0x144] sm:$0xf]  ;;  %v4159_v0 = vor.u32 %v4765_v28, %v4156_v52  ;;  %v4135_v63 = vor.u32 %v4759_v50, %v4132_v53  ;;  %v4124_v27 = vld [vmem:[%s5924_s17 + $0x88] sm:$0xf0]  ;;  %v4372_v28 = vld [vmem:[%s5924_s17 + $0x278] sm:$0xf0] }
 0x2a8   : > { %3000 = vmatpush.bf16.msrb.mxu3 %v4515_v62  ;;  %v4095_v62 = vor.u32 %v4749_v47, %v4092_v12  ;;  %v4223_v17 = vor.u32 %v4781_v61, %v4220_v16  ;;  %v4757_v1 = vld [vmem:[%s5924_s17 + $0x84] sm:$0xf]  ;;  %v4252_v47 = vld [vmem:[%s5924_s17 + $0x188] sm:$0xf0]  ;;  %v4819_v12 = vld [vmem:[%s5924_s17 + $0x274] sm:$0xf] }
 0x2a9   : > { %2962 = vmatpush.bf16.msrb.mxu0 %v4315_v21  ;;  %v4148_v21 = vld [vmem:[%s5924_s17 + $0xb8] sm:$0xf0]  ;;  %v4773_v31 = vld [vmem:[%s5924_s17 + $0x104] sm:$0xf]  ;;  %v4851_v16 = vld [vmem:[%s5924_s17 + $0x374] sm:$0xf]  ;;  %v4127_v49 = vor.u32 %v4757_v1, %v4124_v27 }
 0x2aa   : > { %2975 = vmatpush.bf16.msrb.mxu1 %v4379_v24  ;;  %v4276_v24 = vld [vmem:[%s5924_s17 + $0x1b8] sm:$0xf0]  ;;  %v4151_v26 = vor.u32 %v4763_v13, %v4148_v21  ;;  %v4817_v21 = vld [vmem:[%s5924_s17 + $0x264] sm:$0xf]  ;;  %v4364_v22 = vld [vmem:[%s5924_s17 + $0x268] sm:$0xf0] }
 0x2ab   : > { %2988 = vmatpush.bf16.msrb.mxu2 %v4443_v25  ;;  %v4087_v25 = vor.u32 %v4747_v9, %v4084_v20  ;;  %v4279_v39 = vor.u32 %v4795_v11, %v4276_v24  ;;  %v4436_v61 = vld [vmem:[%s5924_s17 + $0x2f8] sm:$0xf0]  ;;  %v4375_v20 = vor.u32 %v4819_v12, %v4372_v28  ;;  %v4833_v23 = vld [vmem:[%s5924_s17 + $0x2e4] sm:$0xf]  ;;  %v4428_v24 = vld [vmem:[%s5924_s17 + $0x2e8] sm:$0xf0] }
 0x2ac   : > { %3001 = vmatpush.bf16.msrb.mxu3 %v4507_v35  ;;  %2963 = vmatmul.bf16.vlgmr.msrb.gmra.mxu0 %v6450_v51  ;;  %v4076_v35 = vld [vmem:[%s5924_s17 + $0x28] sm:$0xf0]  ;;  %v4500_v8 = vld [vmem:[%s5924_s17 + $0x378] sm:$0xf0]  ;;  %v4827_v1 = vld [vmem:[%s5924_s17 + $0x2b4] sm:$0xf] }
 0x2ad   : > { %3007 = vmatpush.bf16.msra.mxu0 %v4119_v36  ;;  %2976 = vmatmul.bf16.vlgmr.msrb.gmra.mxu1 %v6456_v55  ;;  %v4761_v36 = vld [vmem:[%s5924_s17 + $0xa4] sm:$0xf]  ;;  %v4079_v6 = vor.u32 %v4745_v34, %v4076_v35  ;;  %v4556_v34 = vld [vmem:[%s5924_s17 + $0x3e8] sm:$0xf0]  ;;  %v4367_v35 = vor.u32 %v4817_v21, %v4364_v22  ;;  %v4548_v46 = vld [vmem:[%s5924_s17 + $0x3d8] sm:$0xf0] }
 0x2ae   : > { %3020 = vmatpush.bf16.msra.mxu1 %v4183_v40  ;;  %2989 = vmatmul.bf16.vlgmr.msrb.gmra.mxu2 %v6445_v37  ;;  %v4204_v40 = vld [vmem:[%s5924_s17 + $0x128] sm:$0xf0]  ;;  %v4143_v44 = vor.u32 %v4761_v36, %v4140_v7  ;;  %v4431_v36 = vor.u32 %v4833_v23, %v4428_v24  ;;  %v4815_v7 = vld [vmem:[%s5924_s17 + $0x254] sm:$0xf]  ;;  %v4324_v22 = vld [vmem:[%s5924_s17 + $0x218] sm:$0xf0] }
 0x2af   : > { %3033 = vmatpush.bf16.msra.mxu2 %v4247_v41  ;;  %3002 = vmatmul.bf16.vlgmr.msrb.gmra.mxu3 %v6452_v38  ;;  %v4793_v41 = vld [vmem:[%s5924_s17 + $0x1a4] sm:$0xf]  ;;  %v4348_v53 = vld [vmem:[%s5924_s17 + $0x248] sm:$0xf0]  ;;  %v4807_v21 = vld [vmem:[%s5924_s17 + $0x214] sm:$0xf] }
 0x2b0   : > { %3046 = vmatpush.bf16.msra.mxu3 %v4311_v45  ;;  %v4207_v45 = vor.u32 %v4777_v5, %v4204_v40  ;;  %v4271_v30 = vor.u32 %v4793_v41, %v4268_v42  ;;  %v4356_v5 = vld [vmem:[%s5924_s17 + $0x258] sm:$0xf0]  ;;  %v4831_v40 = vld [vmem:[%s5924_s17 + $0x2d4] sm:$0xf] }
 0x2b1   : > { %3008 = vmatpush.bf16.msra.mxu0 %v4111_v54  ;;  %v4775_v54 = vld [vmem:[%s5924_s17 + $0x114] sm:$0xf]  ;;  %v4420_v42 = vld [vmem:[%s5924_s17 + $0x2d8] sm:$0xf0]  ;;  %v4359_v48 = vor.u32 %v4815_v7, %v4356_v5  ;;  %v4805_v7 = vld [vmem:[%s5924_s17 + $0x204] sm:$0xf] }
 0x2b2   : > { %3021 = vmatpush.bf16.msra.mxu1 %v4175_v57  ;;  %v4196_v57 = vld [vmem:[%s5924_s17 + $0x118] sm:$0xf0]  ;;  %v4823_v23 = vld [vmem:[%s5924_s17 + $0x294] sm:$0xf]  ;;  %v4316_v5 = vld [vmem:[%s5924_s17 + $0x208] sm:$0xf0] }
 0x2b3   : > { %3034 = vmatpush.bf16.msra.mxu2 %v4239_v58  ;;  %v4791_v58 = vld [vmem:[%s5924_s17 + $0x194] sm:$0xf]  ;;  %v4199_v56 = vor.u32 %v4775_v54, %v4196_v57  ;;  %v4829_v54 = vld [vmem:[%s5924_s17 + $0x2c4] sm:$0xf]  ;;  %v4412_v57 = vld [vmem:[%s5924_s17 + $0x2c8] sm:$0xf0] }
 0x2b4   : > { %3047 = vmatpush.bf16.msra.mxu3 %v4303_v60  ;;  %v4060_v60 = vld [vmem:[%s5924_s17 + $0x8] sm:$0xf0]  ;;  %v4388_v24 = vld [vmem:[%s5924_s17 + $0x298] sm:$0xf0] }
 0x2b5   : > { %3009 = vmatpush.bf16.msra.mxu0 %v4103_v3  ;;  %v4263_v3 = vor.u32 %v4791_v58, %v4260_v59  ;;  %v4063_v52 = vor.u32 %v4741_v32, %v4060_v60  ;;  %v4476_v58 = vld [vmem:[%s5924_s17 + $0x348] sm:$0xf0]  ;;  %v4861_v59 = vld [vmem:[%s5924_s17 + $0x3c4] sm:$0xf]  ;;  %v4415_v32 = vor.u32 %v4829_v54, %v4412_v57  ;;  %v6584_v57 = vld [vmem:[%s675_s26] sm:$0x3] }
 0x2b6   : > { %3022 = vmatpush.bf16.msra.mxu1 %v4167_v4  ;;  %v4188_v4 = vld [vmem:[%s5924_s17 + $0x108] sm:$0xf0] }
 0x2b7   : > { %3035 = vmatpush.bf16.msra.mxu2 %v4231_v29  ;;  %v4789_v29 = vld [vmem:[%s5924_s17 + $0x184] sm:$0xf] }
 0x2b8   : > { %3048 = vmatpush.bf16.msra.mxu3 %v4295_v15  ;;  %v4835_v15 = vld [vmem:[%s5924_s17 + $0x2f4] sm:$0xf]  ;;  %v4255_v9 = vor.u32 %v4789_v29, %v4252_v47  ;;  %v4532_v47 = vld [vmem:[%s5924_s17 + $0x3b8] sm:$0xf0] }
 0x2b9   : > { %3010 = vmatpush.bf16.msra.mxu0 %v4095_v62  ;;  %v4191_v62 = vor.u32 %v4773_v31, %v4188_v4  ;;  %v4439_v13 = vor.u32 %v4835_v15, %v4436_v61  ;;  %v4404_v31 = vld [vmem:[%s5924_s17 + $0x2b8] sm:$0xf0]  ;;  %v4859_v29 = vld [vmem:[%s5924_s17 + $0x3b4] sm:$0xf]  ;;  %v4332_v61 = vld [vmem:[%s5924_s17 + $0x228] sm:$0xf0] }
 0x2ba   : > { %3023 = vmatpush.bf16.msra.mxu1 %v4159_v0  ;;  %v4867_v0 = vld [vmem:[%s5924_s17 + $0x3f4] sm:$0xf]  ;;  %v4468_v4 = vld [vmem:[%s5924_s17 + $0x338] sm:$0xf0]  ;;  %v4407_v28 = vor.u32 %v4827_v1, %v4404_v31 }
 0x2bb   : > { %3036 = vmatpush.bf16.msra.mxu2 %v4223_v17  ;;  %v4564_v17 = vld [vmem:[%s5924_s17 + $0x3f8] sm:$0xf0] }
 0x2bc   : > { %3049 = vmatpush.bf16.msra.mxu3 %v4287_v10  ;;  %v4503_v10 = vor.u32 %v4851_v16, %v4500_v8  ;;  %v4567_v11 = vor.u32 %v4867_v0, %v4564_v17  ;;  %v4825_v16 = vld [vmem:[%s5924_s17 + $0x2a4] sm:$0xf]  ;;  %v4535_v8 = vor.u32 %v4859_v29, %v4532_v47  ;;  %v4460_v0 = vld [vmem:[%s5924_s17 + $0x328] sm:$0xf0] }
 0x2bd   : > { %3011 = vmatpush.bf16.msra.mxu0 %v4087_v25  ;;  %v4849_v25 = vld [vmem:[%s5924_s17 + $0x364] sm:$0xf] }
 0x2be   : > { %3024 = vmatpush.bf16.msra.mxu1 %v4151_v26  ;;  %v4492_v26 = vld [vmem:[%s5924_s17 + $0x368] sm:$0xf0]  ;;  %v4857_v17 = vld [vmem:[%s5924_s17 + $0x3a4] sm:$0xf] }
 0x2bf   : > { %3037 = vmatpush.bf16.msra.mxu2 %v4215_v33  ;;  %v4865_v33 = vld [vmem:[%s5924_s17 + $0x3e4] sm:$0xf] }
 0x2c0   : > { %3050 = vmatpush.bf16.msra.mxu3 %v4279_v39  ;;  %v4495_v39 = vor.u32 %v4849_v25, %v4492_v26  ;;  %v4559_v41 = vor.u32 %v4865_v33, %v4556_v34  ;;  %v4839_v25 = vld [vmem:[%s5924_s17 + $0x314] sm:$0xf]  ;;  %v4452_v26 = vld [vmem:[%s5924_s17 + $0x318] sm:$0xf0] }
 0x2c1   : > { %3012 = vmatpush.bf16.msra.mxu0 %v4079_v6  ;;  %v4847_v6 = vld [vmem:[%s5924_s17 + $0x354] sm:$0xf]  ;;  %v4516_v34 = vld [vmem:[%s5924_s17 + $0x398] sm:$0xf0] }
 0x2c2   : > { %3025 = vmatpush.bf16.msra.mxu1 %v4143_v44  ;;  %v4484_v44 = vld [vmem:[%s5924_s17 + $0x358] sm:$0xf0]  ;;  %v4855_v33 = vld [vmem:[%s5924_s17 + $0x394] sm:$0xf] }
 0x2c3   : > { %3038 = vmatpush.bf16.msra.mxu2 %v4207_v45  ;;  %v4863_v45 = vld [vmem:[%s5924_s17 + $0x3d4] sm:$0xf]  ;;  %v4487_v50 = vor.u32 %v4847_v6, %v4484_v44  ;;  %v4837_v6 = vld [vmem:[%s5924_s17 + $0x304] sm:$0xf]  ;;  %v4444_v44 = vld [vmem:[%s5924_s17 + $0x308] sm:$0xf0] }
 0x2c4   : > { %3051 = vmatpush.bf16.msra.mxu3 %v4271_v30  ;;  %v4813_v30 = vld [vmem:[%s5924_s17 + $0x244] sm:$0xf] }
 0x2c5   : > { %3013 = vmatpush.bf16.msra.mxu0 %v4071_v43  ;;  %v4351_v43 = vor.u32 %v4813_v30, %v4348_v53 }
 0x2c6   : > { %3026 = vmatpush.bf16.msra.mxu1 %v4135_v63  ;;  %v4811_v63 = vld [vmem:[%s5924_s17 + $0x234] sm:$0xf] }
 0x2c7   : > { %3039 = vmatpush.bf16.msra.mxu2 %v4199_v56  ;;  %v4340_v56 = vld [vmem:[%s5924_s17 + $0x238] sm:$0xf0] }
 0x2c8   : > { %3052 = vmatpush.bf16.msra.mxu3 %v4263_v3  ;;  %v4843_v3 = vld [vmem:[%s5924_s17 + $0x334] sm:$0xf]  ;;  %v4343_v12 = vor.u32 %v4811_v63, %v4340_v56  ;;  %v5611_v63 = vmov 8.0  }
 0x2c9   : > { %3014 = vmatpush.bf16.msra.mxu0 %v4063_v52  ;;  %v4471_v15 = vor.u32 %v4843_v3, %v4468_v4  ;;  %v4809_v52 = vld [vmem:[%s5924_s17 + $0x224] sm:$0xf]  ;;  %5069 = vrcp.f32 %v5611_v63 }
 0x2ca   : > { %3027 = vmatpush.bf16.msra.mxu1 %v4127_v49  ;;  %v4396_v49 = vld [vmem:[%s5924_s17 + $0x2a8] sm:$0xf0] }
 0x2cb   : > { %3040 = vmatpush.bf16.msra.mxu2 %v4191_v62  ;;  %v4841_v62 = vld [vmem:[%s5924_s17 + $0x324] sm:$0xf] }
 0x2cc   : > { %3053 = vmatpush.bf16.msra.mxu3 %v4255_v9  ;;  %3015 = vmatmul.bf16.vlgmr.msra.gmra.mxu0 %v6385_v2  ;;  %v4551_v2 = vor.u32 %v4863_v45, %v4548_v46  ;;  %v4524_v9 = vld [vmem:[%s5924_s17 + $0x3a8] sm:$0xf0]  ;;  %v4853_v45 = vld [vmem:[%s5924_s17 + $0x384] sm:$0xf] }
 0x2cd   : > { %3059 = vmatpush.bf16.msrb.mxu0 %v4375_v20  ;;  %3028 = vmatmul.bf16.vlgmr.msra.gmra.mxu1 %v6389_v19  ;;  %v4540_v19 = vld [vmem:[%s5924_s17 + $0x3c8] sm:$0xf0]  ;;  %v4335_v20 = vor.u32 %v4809_v52, %v4332_v61 }
 0x2ce   : > { %3072 = vmatpush.bf16.msrb.mxu1 %v4439_v13  ;;  %3041 = vmatmul.bf16.vlgmr.msra.gmra.mxu2 %v6377_v14  ;;  %v4423_v14 = vor.u32 %v4831_v40, %v4420_v42  ;;  %v4543_v27 = vor.u32 %v4861_v59, %v4540_v19  ;;  %v4399_v13 = vor.u32 %v4825_v16, %v4396_v49  ;;  %v4821_v40 = vld [vmem:[%s5924_s17 + $0x284] sm:$0xf]  ;;  %v4380_v42 = vld [vmem:[%s5924_s17 + $0x288] sm:$0xf0] }
 0x2cf   : > { %3085 = vmatpush.bf16.msrb.mxu2 %v4503_v10  ;;  %3054 = vmatmul.bf16.vlgmr.msra.gmra.mxu3 %v6387_v18  ;;  %v4845_v18 = vld [vmem:[%s5924_s17 + $0x344] sm:$0xf]  ;;  %v4463_v10 = vor.u32 %v4841_v62, %v4460_v0  ;;  %v4508_v46 = vld [vmem:[%s5924_s17 + $0x388] sm:$0xf0]  ;;  %s6716_s17 = sld [smem:[#allocation39_spill]] }
 0x2d0   : > { %3098 = vmatpush.bf16.msrb.mxu3 %v4567_v11  ;;  %v4479_v60 = vor.u32 %v4845_v18, %v4476_v58  ;;  %v4527_v11 = vor.u32 %v4857_v17, %v4524_v9  ;;  %v4511_v30 = vor.u32 %v4853_v45, %v4508_v46  ;;  %v2259_v58 = vperm.slane %v6584_v57, 0  ;;  %v4876_v16 = vld [vmem:[%s5939_s23 + $0x38] sm:$0xff]  ;;  %v4875_v9 = vld [vmem:[%s5939_s23 + $0x30] sm:$0xff] }
 0x2d1   : > { %3060 = vmatpush.bf16.msrb.mxu0 %v4367_v35  ;;  %v4327_v35 = vor.u32 %v4807_v21, %v4324_v22  ;;  %v4874_v21 = vld [vmem:[%s5939_s23 + $0x28] sm:$0xff] }
 0x2d2   : > { %3073 = vmatpush.bf16.msrb.mxu1 %v4431_v36  ;;  %v4391_v36 = vor.u32 %v4823_v23, %v4388_v24  ;;  %v4873_v24 = vld [vmem:[%s5939_s23 + $0x20] sm:$0xff] }
 0x2d3   : > { %3086 = vmatpush.bf16.msrb.mxu2 %v4495_v39  ;;  %v4455_v39 = vor.u32 %v4839_v25, %v4452_v26 }
 0x2d4   : > { %3099 = vmatpush.bf16.msrb.mxu3 %v4559_v41  ;;  %v4519_v41 = vor.u32 %v4855_v33, %v4516_v34  ;;  %v4872_v33 = vld [vmem:[%s5939_s23 + $0x18] sm:$0xff] }
 0x2d5   : > { %3061 = vmatpush.bf16.msrb.mxu0 %v4359_v48  ;;  %v4319_v48 = vor.u32 %v4805_v7, %v4316_v5  ;;  %p4632_p1 = scmp.ne.s32.totalorder %s6716_s17, 3 }
 0x2d6   : > { %3074 = vmatpush.bf16.msrb.mxu1 %v4423_v14  ;;  %v4383_v14 = vor.u32 %v4821_v40, %v4380_v42 }
 0x2d7   : > { %3087 = vmatpush.bf16.msrb.mxu2 %v4487_v50  ;;  %v4447_v50 = vor.u32 %v4837_v6, %v4444_v44 }
 0x2d8   : > { %3100 = vmatpush.bf16.msrb.mxu3 %v4551_v2 }
 0x2d9   : > { %3062 = vmatpush.bf16.msrb.mxu0 %v4351_v43 }
 0x2da   : > { %3075 = vmatpush.bf16.msrb.mxu1 %v4415_v32 }
 0x2db   : > { %3088 = vmatpush.bf16.msrb.mxu2 %v4479_v60 }
 0x2dc   : > { %3101 = vmatpush.bf16.msrb.mxu3 %v4543_v27 }
 0x2dd   : > { %3063 = vmatpush.bf16.msrb.mxu0 %v4343_v12 }
 0x2de   : > { %3076 = vmatpush.bf16.msrb.mxu1 %v4407_v28 }
 0x2df   : > { %3089 = vmatpush.bf16.msrb.mxu2 %v4471_v15 }
 0x2e0   : > { %3102 = vmatpush.bf16.msrb.mxu3 %v4535_v8 }
 0x2e1   : > { %3064 = vmatpush.bf16.msrb.mxu0 %v4335_v20 }
 0x2e2   : > { %3077 = vmatpush.bf16.msrb.mxu1 %v4399_v13 }
 0x2e3   : > { %3090 = vmatpush.bf16.msrb.mxu2 %v4463_v10 }
 0x2e4   : > { %3103 = vmatpush.bf16.msrb.mxu3 %v4527_v11 }
 0x2e5   : > { %3065 = vmatpush.bf16.msrb.mxu0 %v4327_v35 }
 0x2e6   : > { %3078 = vmatpush.bf16.msrb.mxu1 %v4391_v36 }
 0x2e7   : > { %3091 = vmatpush.bf16.msrb.mxu2 %v4455_v39  ;;  %v4871_v39 = vld [vmem:[%s5939_s23 + $0x10] sm:$0xff] }
 0x2e8   : > { %3104 = vmatpush.bf16.msrb.mxu3 %v4519_v41  ;;  %v4870_v41 = vld [vmem:[%s5939_s23 + $0x8] sm:$0xff] }
 0x2e9   : > { %3066 = vmatpush.bf16.msrb.mxu0 %v4319_v48  ;;  %v4869_v48 = vld [vmem:[%s5939_s23] sm:$0xff] }
 0x2ea   : > { %3079 = vmatpush.bf16.msrb.mxu1 %v4383_v14 }
 0x2eb   : > { %3092 = vmatpush.bf16.msrb.mxu2 %v4447_v50 }
 0x2ec   : > { %3105 = vmatpush.bf16.msrb.mxu3 %v4511_v30  ;;  %3067 = vmatmul.bf16.vlgmr.msrb.gmra.mxu0 %v6450_v51 }
 0x2ed   : > { %3080 = vmatmul.bf16.vlgmr.msrb.gmra.mxu1 %v6456_v55  ;;  %3323 = vmatpush.bf16.msra.mxu0 %v4876_v16 }
 0x2ee   : > { %3093 = vmatmul.bf16.vlgmr.msrb.gmra.mxu2 %v6445_v37 }
 0x2ef   : > { %3106 = vmatmul.bf16.vlgmr.msrb.gmra.mxu3 %v6452_v38  ;;  %v5070_v38 = vpop.eup %5069 }
 0x2f0   : > { %v3126_v3 = vmul.f32 8.0, %v5070_v38  ;;  %vm3130_vm10 = vweird.f32 %v5070_v38 }
 0x2f1   : > { %3324 = vmatpush.bf16.msra.mxu0 %v4875_v9 }
 0x2f2   : > { %v3127_v12 = vsub.f32 1.0, %v3126_v3 }
 0x2f4   : > { %v3128_v8 = vmul.f32 %v5070_v38, %v3127_v12 }
 0x2f5   : > { %3325 = vmatpush.bf16.msra.mxu0 %v4874_v21 }
 0x2f6   : > { %v3129_v20 = vadd.f32 %v5070_v38, %v3128_v8 }
 0x2f8   : > { %v6590_v22 = vsel %vm3130_vm10, %v5070_v38, %v3129_v20  ;;  %v4883_v20 = vld [vmem:[%s5939_s23 + $0x70] sm:$0xff] }
 0x2f9   : > { %3326 = vmatpush.bf16.msra.mxu0 %v4873_v24 }
 0x2fd   : > { %3327 = vmatpush.bf16.msra.mxu0 %v4872_v33 }
 0x301   : > { %3328 = vmatpush.bf16.msra.mxu0 %v4871_v39 }
 0x305   : > { %3329 = vmatpush.bf16.msra.mxu0 %v4870_v41  ;;  %v4878_v41 = vld [vmem:[%s5939_s23 + $0x48] sm:$0xff] }
 0x309   : > { %v2912_v53 = vpop.f32.mrf.mxu0  ;;  %3330 = vmatpush.bf16.msra.mxu0 %v4869_v48 }
 0x30a   : > { %v2925_v54 = vpop.f32.mrf.mxu1  ;;  %v2913_v32 = vadd.f32 %v2912_v53, %v2259_v58  ;;  %v2260_v53 = vperm.slane %v6584_v57, 1 }
 0x30c   : > { %v2926_v60 = vadd.f32 %v2925_v54, %v2913_v32 }
 0x311   : > { %v2938_v2 = vpop.f32.mrf.mxu2  ;;  %v2914_v59 = vpop.f32.mrf.mxu0 }
 0x312   : > { %v2951_v18 = vpop.f32.mrf.mxu3  ;;  %v2927_v19 = vpop.f32.mrf.mxu1  ;;  %v2939_v55 = vadd.f32 %v2938_v2, %v2926_v60  ;;  %v6602_v60 = vld [vmem:[%s685_s27] sm:$0x3] }
 0x314   : > { %v2952_v37 = vadd.f32 %v2951_v18, %v2939_v55 }
 0x319   : > { %v2940_v43 = vpop.f32.mrf.mxu2 }
 0x31a   : > { %v2953_v51 = vpop.f32.mrf.mxu3 }
 0x329   : > { %v2964_v56 = vpop.f32.mrf.mxu0 }
 0x32a   : > { %v2965_v1 = vadd.f32 %v2964_v56, %v2952_v37  ;;  %v2977_v27 = vpop.f32.mrf.mxu1  ;;  %v6606_v56 = vld [vmem:[%s695_s2] sm:$0x3] }
 0x32c   : > { %v2978_v31 = vadd.f32 %v2977_v27, %v2965_v1  ;;  %v3177_v1 = vperm.slane %v6602_v60, 0 }
 0x331   : > { %v2990_v4 = vpop.f32.mrf.mxu2  ;;  %v2966_v15 = vpop.f32.mrf.mxu0 }
 0x332   : > { %v2991_v29 = vadd.f32 %v2990_v4, %v2978_v31  ;;  %v3003_v47 = vpop.f32.mrf.mxu3  ;;  %v2979_v52 = vpop.f32.mrf.mxu1  ;;  %v3184_v4 = vperm.slane %v6606_v56, 0 }
 0x334   : > { %v3004_v28 = vadd.f32 %v3003_v47, %v2991_v29 }
 0x336   : > { %v3113_v61 = vrot.slane %v3004_v28, 4 }
 0x338   : > { %v3114_v49 = vadd.f32 %v3113_v61, %v3004_v28 }
 0x339   : > { %v2992_v62 = vpop.f32.mrf.mxu2 }
 0x33a   : > { %v3115_v0 = vrot.slane %v3114_v49, 2  ;;  %v3005_v17 = vpop.f32.mrf.mxu3  ;;  %v4884_v62 = vld [vmem:[%s5939_s23 + $0x78] sm:$0xff] }
 0x33b   : > { %3336 = vmatpush.bf16.msra.mxu1 %v4884_v62 }
 0x33c   : > { %v3116_v13 = vadd.f32 %v3115_v0, %v3114_v49 }
 0x33e   : > { %v3117_v10 = vrot.slane %v3116_v13, 1 }
 0x33f   : > { %3337 = vmatpush.bf16.msra.mxu1 %v4883_v20 }
 0x340   : > { %v3118_v23 = vadd.f32 %v3117_v10, %v3116_v13 }
 0x342   : > { %v3132_v11 = vmul.f32 %v6590_v22, %v3118_v23 }
 0x344   : > { %v3134_v25 = vsub.f32 %v3004_v28, %v3132_v11  ;;  %v4882_v11 = vld [vmem:[%s5939_s23 + $0x68] sm:$0xff] }
 0x345   : > { %3338 = vmatpush.bf16.msra.mxu1 %v4882_v11 }
 0x346   : > { %v3136_v26 = vmul.f32 %v3134_v25, %v3134_v25 }
 0x348   : > { %v3138_v34 = vrot.slane %v3136_v26, 4 }
 0x349   : > { %v3016_v36 = vpop.f32.mrf.mxu0 }
 0x34a   : > { %v3139_v35 = vadd.f32 %v3138_v34, %v3136_v26  ;;  %v3029_v7 = vpop.f32.mrf.mxu1  ;;  %v3017_v18 = vadd.f32 %v3016_v36, %v2260_v53  ;;  %v4881_v26 = vld [vmem:[%s5939_s23 + $0x60] sm:$0xff] }
 0x34b   : > { %3339 = vmatpush.bf16.msra.mxu1 %v4881_v26 }
 0x34c   : > { %v3140_v5 = vrot.slane %v3139_v35, 2  ;;  %v3030_v59 = vadd.f32 %v3029_v7, %v3017_v18  ;;  %v4879_v7 = vld [vmem:[%s5939_s23 + $0x50] sm:$0xff]  ;;  %v3178_v18 = vperm.slane %v6602_v60, 1 }
 0x34e   : > { %v3141_v40 = vadd.f32 %v3140_v5, %v3139_v35  ;;  %v4880_v35 = vld [vmem:[%s5939_s23 + $0x58] sm:$0xff] }
 0x34f   : > { %3340 = vmatpush.bf16.msra.mxu1 %v4880_v35 }
 0x350   : > { %v3142_v6 = vrot.slane %v3141_v40, 1 }
 0x351   : > { %v3042_v42 = vpop.f32.mrf.mxu2  ;;  %v3018_v46 = vpop.f32.mrf.mxu0 }
 0x352   : > { %v3055_v44 = vpop.f32.mrf.mxu3  ;;  %v3143_v45 = vadd.f32 %v3142_v6, %v3141_v40  ;;  %v3031_v14 = vpop.f32.mrf.mxu1  ;;  %v3043_v32 = vadd.f32 %v3042_v42, %v3030_v59  ;;  %v4877_v6 = vld [vmem:[%s5939_s23 + $0x40] sm:$0xff] }
 0x353   : > { %3341 = vmatpush.bf16.msra.mxu1 %v4879_v7 }
 0x354   : > { %v3150_v50 = vmul.f32 %v3143_v45, %v6590_v22  ;;  %v3056_v63 = vadd.f32 %v3055_v44, %v3043_v32 }
 0x356   : > { %v3152_v30 = vadd.f32 1e-05, %v3150_v50 }
 0x357   : > { %3342 = vmatpush.bf16.msra.mxu1 %v4878_v41 }
 0x358   : > { %5071 = vrsqrt.f32 %v3152_v30  ;;  %vm3160_vm12 = vweird.f32 %v3152_v30 }
 0x359   : > { %v3044_v54 = vpop.f32.mrf.mxu2 }
 0x35a   : > { %v3057_v2 = vpop.f32.mrf.mxu3 }
 0x35b   : > { %3343 = vmatpush.bf16.msra.mxu1 %v4877_v6 }
 0x35e   : > { %v5072_v58 = vpop.eup %5071 }
 0x35f   : > { %v3155_v19 = vmul.f32 %v5072_v58, %v3152_v30  ;;  %vm3161_vm11 = vweird.f32 %v5072_v58 }
 0x360   : > { %vm3162_vm13 = vmor %vm3160_vm12, %vm3161_vm11 }
 0x361   : > { %v3156_v43 = vmul.f32 %v5072_v58, %v3155_v19  ;;  %v3185_v19 = vperm.slane %v6606_v56, 1 }
 0x363   : > { %v3157_v51 = vmul.f32 0.5, %v3156_v43 }
 0x365   : > { %v3158_v55 = vsub.f32 1.5, %v3157_v51 }
 0x367   : > { %v3159_v38 = vmul.f32 %v5072_v58, %v3158_v55 }
 0x369   : > { %v3068_v37 = vpop.f32.mrf.mxu0  ;;  %v3163_v31 = vsel %vm3162_vm13, %v5072_v58, %v3159_v38 }
 0x36a   : > { %v3081_v57 = vpop.f32.mrf.mxu1  ;;  %v3069_v27 = vadd.f32 %v3068_v37, %v3056_v63  ;;  %v3174_v3 = vmul.f32 %v3163_v31, %v3134_v25  ;;  %v3192_v37 = vld [vmem:[#allocation25] sm:$0xff] }
 0x36c   : > { %v3181_v29 = vmul.f32 %v3177_v1, %v3174_v3  ;;  %v3082_v47 = vadd.f32 %v3081_v57, %v3069_v27 }
 0x36e   : > { %v3188_v61 = vadd.f32 %v3184_v4, %v3181_v29 }
 0x370   : > { %v3190_v49 = vmax.f32 %v3188_v61, 0.0 }
 0x371   : > { %v3094_v12 = vpop.f32.mrf.mxu2  ;;  %v3070_v52 = vpop.f32.mrf.mxu0 }
 0x372   : > { %v3095_v28 = vadd.f32 %v3094_v12, %v3082_v47  ;;  %v3107_v15 = vpop.f32.mrf.mxu3  ;;  %v3083_v16 = vpop.f32.mrf.mxu1  ;;  %v3193_v17 = vpack.c.bf16 %v3190_v49, %v3190_v49 }
 0x374   : > { %v3108_v8 = vadd.f32 %v3107_v15, %v3095_v28  ;;  %3331 = vmatmul.bf16.vlgmr.msra.gmra.mxu0 %v3193_v17 }
 0x376   : > { %v3119_v0 = vrot.slane %v3108_v8, 4 }
 0x378   : > { %v3120_v9 = vadd.f32 %v3119_v0, %v3108_v8 }
 0x379   : > { %v3096_v13 = vpop.f32.mrf.mxu2 }
 0x37a   : > { %v3121_v10 = vrot.slane %v3120_v9, 2  ;;  %v3109_v21 = vpop.f32.mrf.mxu3 }
 0x37c   : > { %v3122_v23 = vadd.f32 %v3121_v10, %v3120_v9 }
 0x37e   : > { %v3123_v24 = vrot.slane %v3122_v23, 1 }
 0x380   : > { %v3124_v25 = vadd.f32 %v3123_v24, %v3122_v23 }
 0x382   : > { %v3133_v33 = vmul.f32 %v6590_v22, %v3124_v25 }
 0x384   : > { %v3135_v34 = vsub.f32 %v3108_v8, %v3133_v33 }
 0x386   : > { %v3137_v36 = vmul.f32 %v3135_v34, %v3135_v34 }
 0x388   : > { %v3144_v39 = vrot.slane %v3137_v36, 4 }
 0x38a   : > { %v3145_v5 = vadd.f32 %v3144_v39, %v3137_v36 }
 0x38c   : > { %v3146_v40 = vrot.slane %v3145_v5, 2 }
 0x38e   : > { %v3147_v42 = vadd.f32 %v3146_v40, %v3145_v5 }
 0x390   : > { %v3148_v44 = vrot.slane %v3147_v42, 1 }
 0x392   : > { %v3149_v45 = vadd.f32 %v3148_v44, %v3147_v42 }
 0x394   : > { %v3151_v46 = vmul.f32 %v3149_v45, %v6590_v22 }
 0x396   : > { %v3153_v48 = vadd.f32 1e-05, %v3151_v46 }
 0x398   : > { %5073 = vrsqrt.f32 %v3153_v48  ;;  %vm3170_vm15 = vweird.f32 %v3153_v48 }
 0x39e   : > { %v5074_v14 = vpop.eup %5073 }
 0x39f   : > { %v3165_v50 = vmul.f32 %v5074_v14, %v3153_v48  ;;  %vm3171_vm14 = vweird.f32 %v5074_v14 }
 0x3a0   : > { %vm3172_vm0 = vmor %vm3170_vm15, %vm3171_vm14 }
 0x3a1   : > { %v3166_v30 = vmul.f32 %v5074_v14, %v3165_v50 }
 0x3a3   : > { %v3167_v53 = vmul.f32 0.5, %v3166_v30 }
 0x3a5   : > { %v3168_v54 = vsub.f32 1.5, %v3167_v53 }
 0x3a7   : > { %v3169_v2 = vmul.f32 %v5074_v14, %v3168_v54 }
 0x3a9   : > { %v3173_v58 = vsel %vm3172_vm0, %v5074_v14, %v3169_v2 }
 0x3aa   : > { %v3175_v59 = vmul.f32 %v3173_v58, %v3135_v34 }
 0x3ac   : > { %v3182_v43 = vmul.f32 %v3178_v18, %v3175_v59 }
 0x3ae   : > { %v3189_v32 = vadd.f32 %v3185_v19, %v3182_v43 }
 0x3b0   : > { %v3191_v22 = vmax.f32 %v3189_v32, 0.0 }
 0x3b2   : > { %v3194_v51 = vpack.c.bf16 %v3191_v22, %v3191_v22 }
 0x3b4   : > { %3344 = vmatmul.bf16.vlgmr.msra.gmra.mxu1 %v3194_v51 }
 0x3f1   : > { %v3332_v55 = vpop.f32.mrf.mxu0 }
 0x3f9   : > { %v3334_v63 = vpop.f32.mrf.mxu0 }
 0x431   : > { %v3345_v38 = vpop.f32.mrf.mxu1 }
 0x432   : > { %v3346_v57 = vadd.f32 %v3345_v38, %v3332_v55 }
 0x434   : > { %v3349_v1 = vadd.f32 %v3346_v57, %v3192_v37 }
 0x435   : > { %3354 = sbr.rel (%p4632_p1) target bundleno = 1089 (0x441), region = 136 }
 0x436   : > { %3350 = vst [vmem:[#allocation25] sm:$0xff] %v3349_v1 }
 0x439   : > { %v3347_v27 = vpop.f32.mrf.mxu1 }
 0x43a   : > { %v5075_v31 = vld [vmem:[#allocation23] ss:$0 sm:$0xff] }
 0x43d   : > { %v3355_v60 = vld [vmem:[#allocation25] sm:$0xff] }
 0x43e   : > { %v3360_v3 = vadd.f32 %v5075_v31, %v3355_v60 }
 0x440   : > { %3361 = vst [vmem:[#allocation25] sm:$0xff] %v3360_v3 }
 0x441 PF: > { %s6717_s1 = sld [smem:[#allocation39_spill]]  ;;  %s5612_s26 = smov [#allocation24]  }
 0x442   : > { %s3368_s27 = sshll.u32 %s5612_s26, 4  ;;  %s6718_s30 = sld [smem:[#allocation50_spill]]  ;;  %s3369_s27 = int_to_ptr.vmem [resolvable:$true] %s3368_s27 }
 0x443   : > { %s6719_s15 = sld [smem:[#allocation51_spill]]  ;;  %s5613_s13 = smov [#allocation25]  }
 0x444   : > { %s3380_s28 = sshll.u32 %s5613_s13, 4  ;;  %s3381_s28 = int_to_ptr.vmem [resolvable:$true] %s3380_s28 }
 0x447   : > { %p4993_p3 = scmp.eq.s32.totalorder %s6717_s1, 3 }
 0x448   : > { %s3370_s21 = sshll.u32 %s6718_s30, 4  ;;  %s3371_s21 = int_to_ptr.hbm [resolvable:$true] %s3370_s21 }
 0x449   : > { %4928 = dma.vmem_to_hbm [thread:$0]  (%p4993_p3), %s3369_s27, 128, %s3371_s21, [#allocation5]  }
 0x44a   : > { %s3382_s24 = sshll.u32 %s6719_s15, 4  ;;  %s3383_s24 = int_to_ptr.hbm [resolvable:$true] %s3382_s24 }
 0x44b   : > { %4930 = dma.vmem_to_hbm [thread:$0]  (%p4993_p3), %s3381_s28, 128, %s3383_s24, [#allocation26]  }
 0x44c   : > { %5571 = dma.done.wait (%p4993_p3), [#allocation5], 128  }
 0x44d   : > { %5573 = vsyncadd (%p4993_p3), [#allocation5], 4294967168 }
 0x44e   : > { %5575 = dma.done.wait (%p4993_p3), [#allocation26], 128  }
 0x44f   : > { %5577 = vsyncadd (%p4993_p3), [#allocation26], 4294967168 }
 0x450 PF: > { %s6720_s21 = sld [smem:[#allocation41_spill]] }
 0x451   : > { %s6721_s18 = sld [smem:[#allocation37_spill]] }
 0x452   : > { %s6722_s19 = sld [smem:[#allocation38_spill]] }
 0x453   : > { %s6723_s20 = sld [smem:[#allocation42_spill]] }
 0x456   : > { %p38_p4 = scmp.ge.s32.totalorder %s6720_s21, 6  }
 0x458   :  { %40 = sbr.rel (!%p38_p4) target bundleno = 22 (0x16), region = 210 }
 0x45d   :  { %3401 = vsyncpa [#allocation4], 1 }
 0x45e   :  { %3403 = vsyncpa [#allocation4 + $0x1], 1 }
 0x45f   :  { %3404 = vsyncpa [#allocation7], 1 }
 0x460   :  { %3405 = vsyncpa [#allocation10], 1 }
 0x461   :  { %3406 = vsyncpa [#allocation13], 1 }
 0x462   :  { %3407 = vsyncpa [#allocation16], 1 }
 0x463   :  { %3409 = vsyncpa [#allocation16 + $0x1], 1 }
 0x464   :  { %3410 = vsyncpa [#allocation19], 1 }
 0x465   :  { %3412 = vsyncpa [#allocation19 + $0x1], 1 }
 0x466   :  { %3413 = vsyncpa [#allocation22], 1 }
 0x467   :  { %3415 = vsyncpa [#allocation22 + $0x1], 1 }
 0x468   :  { %3416 = vsyncpa [#allocation5], 1 }
 0x469   :  { %3418 = vsyncpa [#allocation5 + $0x1], 1 }
 0x46a   :  { %3419 = vsyncpa [#allocation26], 1 }

</bundles_post_ra>
